<compile_context>
chip_gen: v5e
topology: v5e:2x2
jax: 0.10.0
libtpu: 0.0.40
codegen_flags: <defaults>
</compile_context>

<pallas_src>
import jax
import jax.numpy as jnp
from jax import lax
from jax.experimental import pallas as pl
from jax.experimental.pallas import tpu as pltpu

# ---- static configuration (small synthetic shapes) ----
B, T, D = 2, 8, 32          # batch, time, model size
H = 4                        # attention heads
DK = D // H                  # per-head dim
FF = 64                      # feed-forward hidden dim
K = 15                       # depthwise conv kernel size
PAD = (K - 1) // 2
LN_EPS = 1e-12               # espnet-style LayerNorm eps
BN_EPS = 1e-5
NEG_INF = -1e30

# Packed small-vector table: depthwise taps (K rows) first, then one row per
# (1, width) parameter.  Width = 128 (one lane tile).
VEC_LAYOUT = [
    ("g_ffm", D), ("b_ffm", D), ("g_mha", D), ("b_mha", D),
    ("g_conv", D), ("b_conv", D), ("g_ff", D), ("b_ff", D),
    ("g_fin", D), ("b_fin", D),
    ("bm1", FF), ("bm2", D),
    ("bqkv", 4 * D),          # [scale*(bq+pu) | scale*(bq+pv) | bk | bv]
    ("bo", D),
    ("bpw1", 2 * D), ("bdw", D), ("bpw2", D),
    ("b1", FF), ("b2", D),
]
WDW_ROW = 0
ROW = {name: K + i for i, (name, _) in enumerate(VEC_LAYOUT)}
NV = len(VEC_LAYOUT)
VW = 4 * D                    # 128
VEC_ROWS = K + NV             # 34

# Single weight table with 128-lane-aligned column blocks.
COL_WM1, COL_WQKV, COL_WO, COL_WPW1, COL_WPW2, COL_W1, COL_WM2, COL_W2 = (
    0, 128, 256, 384, 512, 640, 768, 896)
WTAB_COLS = 1024


def _layer_norm(x, g, b):
    mu = jnp.mean(x, axis=-1, keepdims=True)
    var = jnp.mean(jnp.square(x - mu), axis=-1, keepdims=True)
    return (x - mu) * lax.rsqrt(var + LN_EPS) * g + b


def _swish(x):
    return x * jax.nn.sigmoid(x)


def _dot(a, b):
    return jnp.dot(a, b, preferred_element_type=jnp.float32)


def conformer_kernel(x_ref, mask_ref, padm_ref, pos_ref, vec_ref, wtab_ref, y_ref):
    x = x_ref[...].astype(jnp.float32).reshape(B * T, D)      # (B*T, D)
    key_valid = mask_ref[...] > 0.0                           # (B, 1, T)
    pad_mask = padm_ref[...].astype(jnp.float32).reshape(B * T, 1)
    pos = pos_ref[...].astype(jnp.float32)                    # (T, D) projected pos emb
    vec = vec_ref[...]                                        # (VEC_ROWS, VW)

    def vrow(name, width):
        r = ROW[name]
        return vec[r:r + 1, :width]                           # (1, width), static slice

    def wmat(col, rows, width):
        return wtab_ref[0:rows, col:col + width]              # tile-aligned static slice

    # ---------- macaron feed-forward (0.5 folded into wm2/bm2) ----------
    res = x
    h = _layer_norm(x, vrow("g_ffm", D), vrow("b_ffm", D))
    h = _swish(_dot(h, wmat(COL_WM1, D, FF)) + vrow("bm1", FF))
    x = res + _dot(h, wmat(COL_WM2, FF, D)) + vrow("bm2", D)

    # ---------- relative-position MHSA ----------
    # One lane-dense (B*T,D)@(D,4D) projection gives [q+u-bias | q+v-bias | k | v]
    # (1/sqrt(DK) folded into the two q column blocks and their biases).
    res = x
    hN = _layer_norm(x, vrow("g_mha", D), vrow("b_mha", D))
    proj = _dot(hN, wmat(COL_WQKV, D, 4 * D)) + vrow("bqkv", 4 * D)   # (B*T, 4D)
    ctx_parts = []
    for hh in range(H):
        c0 = hh * DK
        qu = proj[:, c0:c0 + DK]
        qv = proj[:, D + c0:D + c0 + DK]
        kh = proj[:, 2 * D + c0:2 * D + c0 + DK].reshape(B, T, DK)
        vh = proj[:, 3 * D + c0:3 * D + c0 + DK].reshape(B, T, DK)
        ph = pos[:, c0:c0 + DK]                                       # (T, DK)
        lhs = jnp.concatenate([qu, qv], axis=-1).reshape(B, T, 2 * DK)
        rhs = jnp.concatenate([kh, jnp.broadcast_to(ph[None], (B, T, DK))],
                              axis=-1)                                # (B, T, 2DK)
        # fused content+position scores: (q+u)@k^T + (q+v)@pos^T in one matmul
        s = jnp.einsum("btk,bsk->bts", lhs, rhs,
                       preferred_element_type=jnp.float32)            # (B, T, T)
        s = jnp.where(key_valid, s, NEG_INF)
        s = s - jnp.max(s, axis=-1, keepdims=True)
        e = jnp.exp(s)
        a = e / jnp.sum(e, axis=-1, keepdims=True)                    # exact reciprocal
        a = jnp.where(key_valid, a, 0.0)
        c = jnp.einsum("bts,bsk->btk", a, vh,
                       preferred_element_type=jnp.float32)            # (B, T, DK)
        ctx_parts.append(c.reshape(B * T, DK))
    ctx = jnp.concatenate(ctx_parts, axis=-1)                         # (B*T, D)
    x = res + _dot(ctx, wmat(COL_WO, D, D)) + vrow("bo", D)

    # ---------- convolution module (eval BN folded into wdw/bdw) ----------
    res = x
    h = _layer_norm(x, vrow("g_conv", D), vrow("b_conv", D))
    h = h * pad_mask                                   # zero padded frames
    h = _dot(h, wmat(COL_WPW1, D, 2 * D)) + vrow("bpw1", 2 * D)       # (B*T, 2D)
    g = h[:, :D] * jax.nn.sigmoid(h[:, D:])                           # GLU
    g3 = g.reshape(B, T, D)
    zpad = jnp.zeros((B, PAD, D), jnp.float32)
    gp = jnp.concatenate([zpad, g3, zpad], axis=1)                    # (B, T+2P, D) value
    wdw = vec[WDW_ROW:WDW_ROW + K, :D]                                # (K, D), BN folded
    acc = gp[:, 0:T, :] * wdw[0:1, :].reshape(1, 1, D)                # init from tap 0
    for kk in range(1, K):
        acc = acc + gp[:, kk:kk + T, :] * wdw[kk:kk + 1, :].reshape(1, 1, D)
    h = _swish(acc.reshape(B * T, D) + vrow("bdw", D))
    h = _dot(h, wmat(COL_WPW2, D, D)) + vrow("bpw2", D)
    h = h * pad_mask
    x = res + h

    # ---------- feed-forward (0.5 folded into w2/b2) ----------
    res = x
    h = _layer_norm(x, vrow("g_ff", D), vrow("b_ff", D))
    h = _swish(_dot(h, wmat(COL_W1, D, FF)) + vrow("b1", FF))
    x = res + _dot(h, wmat(COL_W2, FF, D)) + vrow("b2", D)

    # ---------- final layer norm ----------
    x = _layer_norm(x, vrow("g_fin", D), vrow("b_fin", D))
    y_ref[...] = x.reshape(B, T, D).astype(y_ref.dtype)


# ---------------- one-time host-side parameter folding / packing ----------------
def pack_params(p):
    scale = 1.0 / float(DK) ** 0.5
    f = dict(p)
    # fold ff_scale = 0.5 into the second projection of each FF block
    f["wm2"], f["bm2"] = 0.5 * p["wm2"], 0.5 * p["bm2"]
    f["w2"], f["b2"] = 0.5 * p["w2"], 0.5 * p["b2"]
    # fold eval-mode BatchNorm affine into the depthwise conv
    f["wdw"] = p["wdw"] * p["bns"]
    f["bdw"] = p["bdw"] * p["bns"] + p["bnb"]
    # packed q|q|k|v projection; fold 1/sqrt(DK) and the pos biases into q cols
    wq_s = scale * p["wq"]
    f["wqkv"] = jnp.concatenate([wq_s, wq_s, p["wk"], p["wv"]], axis=1)     # (D, 4D)
    pu = p["pu"].reshape(1, D)
    pv = p["pv"].reshape(1, D)
    f["bqkv"] = jnp.concatenate(
        [scale * (p["bq"] + pu), scale * (p["bq"] + pv), p["bk"], p["bv"]],
        axis=1)                                                             # (1, 4D)

    def pad_row(v):
        v = jnp.asarray(v, jnp.float32).reshape(1, -1)
        return jnp.pad(v, ((0, 0), (0, VW - v.shape[1])))

    wdw_rows = jnp.pad(f["wdw"].astype(jnp.float32), ((0, 0), (0, VW - D)))  # (K, VW)
    vec = jnp.concatenate(
        [wdw_rows] + [pad_row(f[name]) for name, _ in VEC_LAYOUT], axis=0)   # (34, 128)

    wtab = jnp.zeros((FF, WTAB_COLS), jnp.float32)

    def put(tab, col, mat):
        r, c = mat.shape
        return tab.at[:r, col:col + c].set(mat.astype(jnp.float32))

    wtab = put(wtab, COL_WM1, p["wm1"])
    wtab = put(wtab, COL_WQKV, f["wqkv"])
    wtab = put(wtab, COL_WO, p["wo"])
    wtab = put(wtab, COL_WPW1, p["wpw1"])
    wtab = put(wtab, COL_WPW2, p["wpw2"])
    wtab = put(wtab, COL_W1, p["w1"])
    wtab = put(wtab, COL_WM2, f["wm2"])
    wtab = put(wtab, COL_W2, f["w2"])
    return {"vec": vec, "wtab": wtab, "wp": p["wp"]}


def conformer_layer(x, mask, pos_emb, mask_pad, packed):
    """x:(B,T,D) mask:(B,1,T) pos_emb:(1,T,D) mask_pad:(B,1,T) -> (y, mask)."""
    # batch-invariant position projection, hoisted out of the kernel
    pos_proj = pos_emb[0].astype(jnp.float32) @ packed["wp"]         # (T, D)
    mask_pad_t = jnp.transpose(mask_pad, (0, 2, 1)).astype(jnp.float32)  # (B, T, 1)
    vspec = pl.BlockSpec(memory_space=pltpu.MemorySpace.VMEM)
    y = pl.pallas_call(
        conformer_kernel,
        out_shape=jax.ShapeDtypeStruct((B, T, D), jnp.float32),
        in_specs=[vspec] * 6,
        out_specs=vspec,
    )(x, mask, mask_pad_t, pos_proj, packed["vec"], packed["wtab"])
    return y, mask


# ---------------- deterministic parameter init (original, unfolded) ----------------
def init_params(key):
    params = {}
    keys = iter(jax.random.split(key, 64))

    def lin(shape, scale=0.05):
        return (scale * jax.random.normal(next(keys), shape)).astype(jnp.float32)

    for n in ("ffm", "mha", "conv", "ff", "fin"):
        params[f"g_{n}"] = jnp.ones((1, D), jnp.float32)
        params[f"b_{n}"] = jnp.zeros((1, D), jnp.float32)
    params["wm1"], params["bm1"] = lin((D, FF)), lin((1, FF))
    params["wm2"], params["bm2"] = lin((FF, D)), lin((1, D))
    for n in ("q", "k", "v", "o"):
        params[f"w{n}"], params[f"b{n}"] = lin((D, D)), lin((1, D))
    params["wp"] = lin((D, D))
    params["pu"], params["pv"] = lin((H, DK)), lin((H, DK))
    params["wpw1"], params["bpw1"] = lin((D, 2 * D)), lin((1, 2 * D))
    params["wdw"], params["bdw"] = lin((K, D)), lin((1, D))
    gamma = jnp.ones((1, D), jnp.float32)
    beta = jnp.zeros((1, D), jnp.float32)
    mean = jnp.zeros((1, D), jnp.float32)
    var = jnp.ones((1, D), jnp.float32)
    bn_scale = gamma / jnp.sqrt(var + BN_EPS)
    params["bns"] = bn_scale
    params["bnb"] = beta - mean * bn_scale
    params["wpw2"], params["bpw2"] = lin((D, D)), lin((1, D))
    params["w1"], params["b1"] = lin((D, FF)), lin((1, FF))
    params["w2"], params["b2"] = lin((FF, D)), lin((1, D))
    return params


# ---------------- pure-JAX reference (unfolded params, for verification) ----------------
def reference(x, mask, pos_emb, mask_pad, p):
    key_mask = mask[:, 0, :].astype(jnp.float32)       # (B, T)
    pad_mask = mask_pad[:, 0, :].astype(jnp.float32)   # (B, T)
    pos = pos_emb[0]

    res = x
    h = _layer_norm(x, p["g_ffm"], p["b_ffm"])
    h = _swish(h @ p["wm1"] + p["bm1"]) @ p["wm2"] + p["bm2"]
    x = res + 0.5 * h

    res = x
    h = _layer_norm(x, p["g_mha"], p["b_mha"])
    q = (h @ p["wq"] + p["bq"]).reshape(B, T, H, DK)
    k = (h @ p["wk"] + p["bk"]).reshape(B, T, H, DK)
    v = (h @ p["wv"] + p["bv"]).reshape(B, T, H, DK)
    pp = (pos @ p["wp"]).reshape(T, H, DK)
    ac = jnp.einsum("bthd,bshd->bhts", q + p["pu"][None, None], k)
    bd = jnp.einsum("bthd,shd->bhts", q + p["pv"][None, None], pp)
    scores = (ac + bd) / jnp.sqrt(jnp.float32(DK))
    m = key_mask[:, None, None, :] > 0
    scores = jnp.where(m, scores, NEG_INF)
    scores = scores - jnp.max(scores, axis=-1, keepdims=True)
    e = jnp.exp(scores)
    attn = jnp.where(m, e / jnp.sum(e, axis=-1, keepdims=True), 0.0)
    ctx = jnp.einsum("bhts,bshd->bthd", attn, v).reshape(B, T, D)
    x = res + (ctx @ p["wo"] + p["bo"])

    res = x
    h = _layer_norm(x, p["g_conv"], p["b_conv"]) * pad_mask[:, :, None]
    h = h @ p["wpw1"] + p["bpw1"]
    h = h[..., :D] * jax.nn.sigmoid(h[..., D:])
    hp = jnp.pad(h, ((0, 0), (PAD, PAD), (0, 0)))
    acc = jnp.zeros((B, T, D), jnp.float32)
    for kk in range(K):
        acc = acc + hp[:, kk:kk + T, :] * p["wdw"][kk][None, None, :]
    h = acc + p["bdw"]
    h = _swish(h * p["bns"] + p["bnb"])
    h = (h @ p["wpw2"] + p["bpw2"]) * pad_mask[:, :, None]
    x = res + h

    res = x
    h = _layer_norm(x, p["g_ff"], p["b_ff"])
    h = _swish(h @ p["w1"] + p["b1"]) @ p["w2"] + p["b2"]
    x = res + 0.5 * h

    return _layer_norm(x, p["g_fin"], p["b_fin"])


if __name__ == "__main__":
    key = jax.random.PRNGKey(0)
    kx, kp, kprm = jax.random.split(key, 3)
    x = jax.random.normal(kx, (B, T, D), jnp.float32)
    pos_emb = jax.random.normal(kp, (1, T, D), jnp.float32)
    lengths = jnp.array([T, T - 2], jnp.int32)
    valid = (jnp.arange(T)[None, :] < lengths[:, None]).astype(jnp.float32)
    mask = valid[:, None, :]       # (B, 1, T) attention key mask
    mask_pad = valid[:, None, :]   # (B, 1, T) conv padding mask
    params = init_params(kprm)

    packed = pack_params(params)   # one-time host-side fold + pack
    y, mask_out = conformer_layer(x, mask, pos_emb, mask_pad, packed)
    y = jax.block_until_ready(y)

    y_ref = reference(x, mask, pos_emb, mask_pad, params)
    if not bool(jnp.allclose(y, y_ref, atol=3e-3, rtol=3e-3)):
        raise SystemExit("kernel does not match reference")
    print("KERNEL_OK")
</pallas_src>

<mosaic_0001>
module attributes {stable_mosaic.version = 11 : i64} {
  func.func @conformer_kernel(%arg0: memref<2x8x32xf32, #tpu.memory_space<vmem>>, %arg1: memref<2x1x8xf32, #tpu.memory_space<vmem>>, %arg2: memref<2x8x1xf32, #tpu.memory_space<vmem>>, %arg3: memref<8x32xf32, #tpu.memory_space<vmem>>, %arg4: memref<34x128xf32, #tpu.memory_space<vmem>>, %arg5: memref<64x1024xf32, #tpu.memory_space<vmem>>, %arg6: memref<2x8x32xf32, #tpu.memory_space<vmem>>) attributes {dimension_semantics = [], scalar_prefetch = 0 : i64, scratch_operands = 0 : i64, tpu.core_type = #tpu.core_type<tc>} {
    %c0 = arith.constant 0 : index
    %c0_0 = arith.constant 0 : index
    %c0_1 = arith.constant 0 : index
    %0 = vector.load %arg0[%c0, %c0_0, %c0_1] : memref<2x8x32xf32, #tpu.memory_space<vmem>>, vector<2x8x32xf32>
    %1 = vector.shape_cast %0 : vector<2x8x32xf32> to vector<16x32xf32>
    %c0_2 = arith.constant 0 : index
    %c0_3 = arith.constant 0 : index
    %c0_4 = arith.constant 0 : index
    %2 = vector.load %arg1[%c0_2, %c0_3, %c0_4] : memref<2x1x8xf32, #tpu.memory_space<vmem>>, vector<2x1x8xf32>
    %cst = arith.constant 0.000000e+00 : f32
    %3 = vector.broadcast %cst : f32 to vector<2x1x8xf32>
    %4 = arith.cmpf ogt, %2, %3 : vector<2x1x8xf32>
    %c0_5 = arith.constant 0 : index
    %c0_6 = arith.constant 0 : index
    %c0_7 = arith.constant 0 : index
    %5 = vector.load %arg2[%c0_5, %c0_6, %c0_7] : memref<2x8x1xf32, #tpu.memory_space<vmem>>, vector<2x8x1xf32>
    %6 = vector.shape_cast %5 : vector<2x8x1xf32> to vector<16x1xf32>
    %c0_8 = arith.constant 0 : index
    %c0_9 = arith.constant 0 : index
    %7 = vector.load %arg3[%c0_8, %c0_9] : memref<8x32xf32, #tpu.memory_space<vmem>>, vector<8x32xf32>
    %c0_10 = arith.constant 0 : index
    %c0_11 = arith.constant 0 : index
    %8 = vector.load %arg4[%c0_10, %c0_11] : memref<34x128xf32, #tpu.memory_space<vmem>>, vector<34x128xf32>
    %9 = vector.extract_strided_slice %8 {offsets = [15, 0], sizes = [1, 32], strides = [1, 1]} : vector<34x128xf32> to vector<1x32xf32>
    %10 = vector.extract_strided_slice %8 {offsets = [16, 0], sizes = [1, 32], strides = [1, 1]} : vector<34x128xf32> to vector<1x32xf32>
    %cst_12 = arith.constant dense<0.000000e+00> : vector<16xf32>
    %11 = vector.multi_reduction <add>, %1, %cst_12 [1] : vector<16x32xf32> to vector<16xf32>
    %12 = vector.shape_cast %11 : vector<16xf32> to vector<16x1xf32>
    %cst_13 = arith.constant 3.200000e+01 : f32
    %13 = vector.broadcast %cst_13 : f32 to vector<16x1xf32>
    %14 = arith.divf %12, %13 : vector<16x1xf32>
    %15 = vector.broadcast %14 : vector<16x1xf32> to vector<16x32xf32>
    %16 = arith.subf %1, %15 : vector<16x32xf32>
    %17 = arith.mulf %16, %16 : vector<16x32xf32>
    %cst_14 = arith.constant dense<0.000000e+00> : vector<16xf32>
    %18 = vector.multi_reduction <add>, %17, %cst_14 [1] : vector<16x32xf32> to vector<16xf32>
    %19 = vector.shape_cast %18 : vector<16xf32> to vector<16x1xf32>
    %cst_15 = arith.constant 3.200000e+01 : f32
    %20 = vector.broadcast %cst_15 : f32 to vector<16x1xf32>
    %21 = arith.divf %19, %20 : vector<16x1xf32>
    %22 = vector.broadcast %14 : vector<16x1xf32> to vector<16x32xf32>
    %23 = arith.subf %1, %22 : vector<16x32xf32>
    %cst_16 = arith.constant 9.99999996E-13 : f32
    %24 = vector.broadcast %cst_16 : f32 to vector<16x1xf32>
    %25 = arith.addf %21, %24 : vector<16x1xf32>
    %26 = math.rsqrt %25 : vector<16x1xf32>
    %27 = vector.broadcast %26 : vector<16x1xf32> to vector<16x32xf32>
    %28 = arith.mulf %23, %27 : vector<16x32xf32>
    %29 = vector.broadcast %9 : vector<1x32xf32> to vector<16x32xf32>
    %30 = arith.mulf %28, %29 : vector<16x32xf32>
    %31 = vector.broadcast %10 : vector<1x32xf32> to vector<16x32xf32>
    %32 = arith.addf %30, %31 : vector<16x32xf32>
    %c0_17 = arith.constant 0 : index
    %c0_18 = arith.constant 0 : index
    %33 = vector.load %arg5[%c0_17, %c0_18] : memref<64x1024xf32, #tpu.memory_space<vmem>>, vector<32x64xf32>
    %cst_19 = arith.constant dense<0.000000e+00> : vector<16x64xf32>
    %34 = tpu.matmul %32, %33, %cst_19 {dimension_numbers = #tpu.dot_dimension_numbers<[1], [0], [0], [1], [0, 0, 1, 1], [], []>} : vector<16x32xf32>, vector<32x64xf32>, vector<16x64xf32> -> vector<16x64xf32>
    %35 = vector.extract_strided_slice %8 {offsets = [25, 0], sizes = [1, 64], strides = [1, 1]} : vector<34x128xf32> to vector<1x64xf32>
    %36 = vector.broadcast %35 : vector<1x64xf32> to vector<16x64xf32>
    %37 = arith.addf %34, %36 : vector<16x64xf32>
    %38 = arith.negf %37 : vector<16x64xf32>
    %39 = math.exp %38 : vector<16x64xf32>
    %cst_20 = arith.constant 1.000000e+00 : f32
    %40 = vector.broadcast %cst_20 : f32 to vector<16x64xf32>
    %41 = arith.addf %40, %39 : vector<16x64xf32>
    %42 = arith.divf %40, %41 : vector<16x64xf32>
    %43 = arith.mulf %37, %42 : vector<16x64xf32>
    %c0_21 = arith.constant 0 : index
    %c768 = arith.constant 768 : index
    %44 = vector.load %arg5[%c0_21, %c768] : memref<64x1024xf32, #tpu.memory_space<vmem>>, vector<64x32xf32>
    %cst_22 = arith.constant dense<0.000000e+00> : vector<16x32xf32>
    %45 = tpu.matmul %43, %44, %cst_22 {dimension_numbers = #tpu.dot_dimension_numbers<[1], [0], [0], [1], [0, 0, 1, 1], [], []>} : vector<16x64xf32>, vector<64x32xf32>, vector<16x32xf32> -> vector<16x32xf32>
    %46 = arith.addf %1, %45 : vector<16x32xf32>
    %47 = vector.extract_strided_slice %8 {offsets = [26, 0], sizes = [1, 32], strides = [1, 1]} : vector<34x128xf32> to vector<1x32xf32>
    %48 = vector.broadcast %47 : vector<1x32xf32> to vector<16x32xf32>
    %49 = arith.addf %46, %48 : vector<16x32xf32>
    %50 = vector.extract_strided_slice %8 {offsets = [17, 0], sizes = [1, 32], strides = [1, 1]} : vector<34x128xf32> to vector<1x32xf32>
    %51 = vector.extract_strided_slice %8 {offsets = [18, 0], sizes = [1, 32], strides = [1, 1]} : vector<34x128xf32> to vector<1x32xf32>
    %cst_23 = arith.constant dense<0.000000e+00> : vector<16xf32>
    %52 = vector.multi_reduction <add>, %49, %cst_23 [1] : vector<16x32xf32> to vector<16xf32>
    %53 = vector.shape_cast %52 : vector<16xf32> to vector<16x1xf32>
    %cst_24 = arith.constant 3.200000e+01 : f32
    %54 = vector.broadcast %cst_24 : f32 to vector<16x1xf32>
    %55 = arith.divf %53, %54 : vector<16x1xf32>
    %56 = vector.broadcast %55 : vector<16x1xf32> to vector<16x32xf32>
    %57 = arith.subf %49, %56 : vector<16x32xf32>
    %58 = arith.mulf %57, %57 : vector<16x32xf32>
    %cst_25 = arith.constant dense<0.000000e+00> : vector<16xf32>
    %59 = vector.multi_reduction <add>, %58, %cst_25 [1] : vector<16x32xf32> to vector<16xf32>
    %60 = vector.shape_cast %59 : vector<16xf32> to vector<16x1xf32>
    %cst_26 = arith.constant 3.200000e+01 : f32
    %61 = vector.broadcast %cst_26 : f32 to vector<16x1xf32>
    %62 = arith.divf %60, %61 : vector<16x1xf32>
    %63 = vector.broadcast %55 : vector<16x1xf32> to vector<16x32xf32>
    %64 = arith.subf %49, %63 : vector<16x32xf32>
    %cst_27 = arith.constant 9.99999996E-13 : f32
    %65 = vector.broadcast %cst_27 : f32 to vector<16x1xf32>
    %66 = arith.addf %62, %65 : vector<16x1xf32>
    %67 = math.rsqrt %66 : vector<16x1xf32>
    %68 = vector.broadcast %67 : vector<16x1xf32> to vector<16x32xf32>
    %69 = arith.mulf %64, %68 : vector<16x32xf32>
    %70 = vector.broadcast %50 : vector<1x32xf32> to vector<16x32xf32>
    %71 = arith.mulf %69, %70 : vector<16x32xf32>
    %72 = vector.broadcast %51 : vector<1x32xf32> to vector<16x32xf32>
    %73 = arith.addf %71, %72 : vector<16x32xf32>
    %c0_28 = arith.constant 0 : index
    %c128 = arith.constant 128 : index
    %74 = vector.load %arg5[%c0_28, %c128] : memref<64x1024xf32, #tpu.memory_space<vmem>>, vector<32x128xf32>
    %cst_29 = arith.constant dense<0.000000e+00> : vector<16x128xf32>
    %75 = tpu.matmul %73, %74, %cst_29 {dimension_numbers = #tpu.dot_dimension_numbers<[1], [0], [0], [1], [0, 0, 1, 1], [], []>} : vector<16x32xf32>, vector<32x128xf32>, vector<16x128xf32> -> vector<16x128xf32>
    %76 = vector.extract_strided_slice %8 {offsets = [27, 0], sizes = [1, 128], strides = [1, 1]} : vector<34x128xf32> to vector<1x128xf32>
    %77 = vector.broadcast %76 : vector<1x128xf32> to vector<16x128xf32>
    %78 = arith.addf %75, %77 : vector<16x128xf32>
    %79 = vector.extract_strided_slice %78 {offsets = [0, 0], sizes = [16, 8], strides = [1, 1]} : vector<16x128xf32> to vector<16x8xf32>
    %80 = vector.extract_strided_slice %78 {offsets = [0, 32], sizes = [16, 8], strides = [1, 1]} : vector<16x128xf32> to vector<16x8xf32>
    %81 = vector.extract_strided_slice %78 {offsets = [0, 64], sizes = [16, 8], strides = [1, 1]} : vector<16x128xf32> to vector<16x8xf32>
    %82 = vector.shape_cast %81 : vector<16x8xf32> to vector<2x8x8xf32>
    %83 = vector.extract_strided_slice %78 {offsets = [0, 96], sizes = [16, 8], strides = [1, 1]} : vector<16x128xf32> to vector<16x8xf32>
    %84 = vector.shape_cast %83 : vector<16x8xf32> to vector<2x8x8xf32>
    %85 = vector.extract_strided_slice %7 {offsets = [0, 0], sizes = [8, 8], strides = [1, 1]} : vector<8x32xf32> to vector<8x8xf32>
    %86 = tpu.concatenate %79, %80 in 1 : vector<16x8xf32>, vector<16x8xf32> -> vector<16x16xf32>
    %87 = vector.shape_cast %86 : vector<16x16xf32> to vector<2x8x16xf32>
    %88 = vector.shape_cast %85 : vector<8x8xf32> to vector<1x8x8xf32>
    %89 = vector.shape_cast %88 : vector<1x8x8xf32> to vector<1x8x8xf32>
    %90 = vector.broadcast %89 : vector<1x8x8xf32> to vector<2x8x8xf32>
    %91 = tpu.concatenate %82, %90 in 2 : vector<2x8x8xf32>, vector<2x8x8xf32> -> vector<2x8x16xf32>
    "tpu.trace_start"() <{level = 10 : i32, message = "btk,bsk->bts"}> : () -> ()
    %cst_30 = arith.constant dense<0.000000e+00> : vector<2x8x8xf32>
    %92 = tpu.matmul %87, %91, %cst_30 {dimension_numbers = #tpu.dot_dimension_numbers<[2], [2], [1], [1], [0, 0, 0, 1, 1, 1], [0], [0]>} : vector<2x8x16xf32>, vector<2x8x16xf32>, vector<2x8x8xf32> -> vector<2x8x8xf32>
    %cst_31 = arith.constant -1.000000e+30 : f32
    "tpu.trace_stop"() : () -> ()
    %93 = vector.shape_cast %4 : vector<2x1x8xi1> to vector<2x1x8xi1>
    %94 = vector.broadcast %93 : vector<2x1x8xi1> to vector<2x8x8xi1>
    %95 = vector.broadcast %cst_31 : f32 to vector<2x8x8xf32>
    %96 = arith.select %94, %92, %95 : vector<2x8x8xi1>, vector<2x8x8xf32>
    %cst_32 = arith.constant dense<0xFF800000> : vector<2x8xf32>
    %97 = vector.multi_reduction <maximumf>, %96, %cst_32 [2] : vector<2x8x8xf32> to vector<2x8xf32>
    %98 = vector.shape_cast %97 : vector<2x8xf32> to vector<2x8x1xf32>
    %99 = vector.broadcast %98 : vector<2x8x1xf32> to vector<2x8x8xf32>
    %100 = arith.subf %96, %99 : vector<2x8x8xf32>
    %101 = math.exp %100 : vector<2x8x8xf32>
    %cst_33 = arith.constant dense<0.000000e+00> : vector<2x8xf32>
    %102 = vector.multi_reduction <add>, %101, %cst_33 [2] : vector<2x8x8xf32> to vector<2x8xf32>
    %103 = vector.shape_cast %102 : vector<2x8xf32> to vector<2x8x1xf32>
    %104 = vector.broadcast %103 : vector<2x8x1xf32> to vector<2x8x8xf32>
    %105 = arith.divf %101, %104 : vector<2x8x8xf32>
    %cst_34 = arith.constant 0.000000e+00 : f32
    %106 = vector.shape_cast %4 : vector<2x1x8xi1> to vector<2x1x8xi1>
    %107 = vector.broadcast %106 : vector<2x1x8xi1> to vector<2x8x8xi1>
    %108 = vector.broadcast %cst_34 : f32 to vector<2x8x8xf32>
    %109 = arith.select %107, %105, %108 : vector<2x8x8xi1>, vector<2x8x8xf32>
    "tpu.trace_start"() <{level = 10 : i32, message = "bts,bsk->btk"}> : () -> ()
    %cst_35 = arith.constant dense<0.000000e+00> : vector<2x8x8xf32>
    %110 = tpu.matmul %109, %84, %cst_35 {dimension_numbers = #tpu.dot_dimension_numbers<[2], [1], [1], [2], [0, 0, 0, 1, 1, 2], [0], [0]>} : vector<2x8x8xf32>, vector<2x8x8xf32>, vector<2x8x8xf32> -> vector<2x8x8xf32>
    "tpu.trace_stop"() : () -> ()
    %111 = vector.shape_cast %110 : vector<2x8x8xf32> to vector<16x8xf32>
    %112 = vector.extract_strided_slice %78 {offsets = [0, 8], sizes = [16, 8], strides = [1, 1]} : vector<16x128xf32> to vector<16x8xf32>
    %113 = vector.extract_strided_slice %78 {offsets = [0, 40], sizes = [16, 8], strides = [1, 1]} : vector<16x128xf32> to vector<16x8xf32>
    %114 = vector.extract_strided_slice %78 {offsets = [0, 72], sizes = [16, 8], strides = [1, 1]} : vector<16x128xf32> to vector<16x8xf32>
    %115 = vector.shape_cast %114 : vector<16x8xf32> to vector<2x8x8xf32>
    %116 = vector.extract_strided_slice %78 {offsets = [0, 104], sizes = [16, 8], strides = [1, 1]} : vector<16x128xf32> to vector<16x8xf32>
    %117 = vector.shape_cast %116 : vector<16x8xf32> to vector<2x8x8xf32>
    %118 = vector.extract_strided_slice %7 {offsets = [0, 8], sizes = [8, 8], strides = [1, 1]} : vector<8x32xf32> to vector<8x8xf32>
    %119 = tpu.concatenate %112, %113 in 1 : vector<16x8xf32>, vector<16x8xf32> -> vector<16x16xf32>
    %120 = vector.shape_cast %119 : vector<16x16xf32> to vector<2x8x16xf32>
    %121 = vector.shape_cast %118 : vector<8x8xf32> to vector<1x8x8xf32>
    %122 = vector.shape_cast %121 : vector<1x8x8xf32> to vector<1x8x8xf32>
    %123 = vector.broadcast %122 : vector<1x8x8xf32> to vector<2x8x8xf32>
    %124 = tpu.concatenate %115, %123 in 2 : vector<2x8x8xf32>, vector<2x8x8xf32> -> vector<2x8x16xf32>
    "tpu.trace_start"() <{level = 10 : i32, message = "btk,bsk->bts"}> : () -> ()
    %cst_36 = arith.constant dense<0.000000e+00> : vector<2x8x8xf32>
    %125 = tpu.matmul %120, %124, %cst_36 {dimension_numbers = #tpu.dot_dimension_numbers<[2], [2], [1], [1], [0, 0, 0, 1, 1, 1], [0], [0]>} : vector<2x8x16xf32>, vector<2x8x16xf32>, vector<2x8x8xf32> -> vector<2x8x8xf32>
    %cst_37 = arith.constant -1.000000e+30 : f32
    "tpu.trace_stop"() : () -> ()
    %126 = vector.shape_cast %4 : vector<2x1x8xi1> to vector<2x1x8xi1>
    %127 = vector.broadcast %126 : vector<2x1x8xi1> to vector<2x8x8xi1>
    %128 = vector.broadcast %cst_37 : f32 to vector<2x8x8xf32>
    %129 = arith.select %127, %125, %128 : vector<2x8x8xi1>, vector<2x8x8xf32>
    %cst_38 = arith.constant dense<0xFF800000> : vector<2x8xf32>
    %130 = vector.multi_reduction <maximumf>, %129, %cst_38 [2] : vector<2x8x8xf32> to vector<2x8xf32>
    %131 = vector.shape_cast %130 : vector<2x8xf32> to vector<2x8x1xf32>
    %132 = vector.broadcast %131 : vector<2x8x1xf32> to vector<2x8x8xf32>
    %133 = arith.subf %129, %132 : vector<2x8x8xf32>
    %134 = math.exp %133 : vector<2x8x8xf32>
    %cst_39 = arith.constant dense<0.000000e+00> : vector<2x8xf32>
    %135 = vector.multi_reduction <add>, %134, %cst_39 [2] : vector<2x8x8xf32> to vector<2x8xf32>
    %136 = vector.shape_cast %135 : vector<2x8xf32> to vector<2x8x1xf32>
    %137 = vector.broadcast %136 : vector<2x8x1xf32> to vector<2x8x8xf32>
    %138 = arith.divf %134, %137 : vector<2x8x8xf32>
    %cst_40 = arith.constant 0.000000e+00 : f32
    %139 = vector.shape_cast %4 : vector<2x1x8xi1> to vector<2x1x8xi1>
    %140 = vector.broadcast %139 : vector<2x1x8xi1> to vector<2x8x8xi1>
    %141 = vector.broadcast %cst_40 : f32 to vector<2x8x8xf32>
    %142 = arith.select %140, %138, %141 : vector<2x8x8xi1>, vector<2x8x8xf32>
    "tpu.trace_start"() <{level = 10 : i32, message = "bts,bsk->btk"}> : () -> ()
    %cst_41 = arith.constant dense<0.000000e+00> : vector<2x8x8xf32>
    %143 = tpu.matmul %142, %117, %cst_41 {dimension_numbers = #tpu.dot_dimension_numbers<[2], [1], [1], [2], [0, 0, 0, 1, 1, 2], [0], [0]>} : vector<2x8x8xf32>, vector<2x8x8xf32>, vector<2x8x8xf32> -> vector<2x8x8xf32>
    "tpu.trace_stop"() : () -> ()
    %144 = vector.shape_cast %143 : vector<2x8x8xf32> to vector<16x8xf32>
    %145 = vector.extract_strided_slice %78 {offsets = [0, 16], sizes = [16, 8], strides = [1, 1]} : vector<16x128xf32> to vector<16x8xf32>
    %146 = vector.extract_strided_slice %78 {offsets = [0, 48], sizes = [16, 8], strides = [1, 1]} : vector<16x128xf32> to vector<16x8xf32>
    %147 = vector.extract_strided_slice %78 {offsets = [0, 80], sizes = [16, 8], strides = [1, 1]} : vector<16x128xf32> to vector<16x8xf32>
    %148 = vector.shape_cast %147 : vector<16x8xf32> to vector<2x8x8xf32>
    %149 = vector.extract_strided_slice %78 {offsets = [0, 112], sizes = [16, 8], strides = [1, 1]} : vector<16x128xf32> to vector<16x8xf32>
    %150 = vector.shape_cast %149 : vector<16x8xf32> to vector<2x8x8xf32>
    %151 = vector.extract_strided_slice %7 {offsets = [0, 16], sizes = [8, 8], strides = [1, 1]} : vector<8x32xf32> to vector<8x8xf32>
    %152 = tpu.concatenate %145, %146 in 1 : vector<16x8xf32>, vector<16x8xf32> -> vector<16x16xf32>
    %153 = vector.shape_cast %152 : vector<16x16xf32> to vector<2x8x16xf32>
    %154 = vector.shape_cast %151 : vector<8x8xf32> to vector<1x8x8xf32>
    %155 = vector.shape_cast %154 : vector<1x8x8xf32> to vector<1x8x8xf32>
    %156 = vector.broadcast %155 : vector<1x8x8xf32> to vector<2x8x8xf32>
    %157 = tpu.concatenate %148, %156 in 2 : vector<2x8x8xf32>, vector<2x8x8xf32> -> vector<2x8x16xf32>
    "tpu.trace_start"() <{level = 10 : i32, message = "btk,bsk->bts"}> : () -> ()
    %cst_42 = arith.constant dense<0.000000e+00> : vector<2x8x8xf32>
    %158 = tpu.matmul %153, %157, %cst_42 {dimension_numbers = #tpu.dot_dimension_numbers<[2], [2], [1], [1], [0, 0, 0, 1, 1, 1], [0], [0]>} : vector<2x8x16xf32>, vector<2x8x16xf32>, vector<2x8x8xf32> -> vector<2x8x8xf32>
    %cst_43 = arith.constant -1.000000e+30 : f32
    "tpu.trace_stop"() : () -> ()
    %159 = vector.shape_cast %4 : vector<2x1x8xi1> to vector<2x1x8xi1>
    %160 = vector.broadcast %159 : vector<2x1x8xi1> to vector<2x8x8xi1>
    %161 = vector.broadcast %cst_43 : f32 to vector<2x8x8xf32>
    %162 = arith.select %160, %158, %161 : vector<2x8x8xi1>, vector<2x8x8xf32>
    %cst_44 = arith.constant dense<0xFF800000> : vector<2x8xf32>
    %163 = vector.multi_reduction <maximumf>, %162, %cst_44 [2] : vector<2x8x8xf32> to vector<2x8xf32>
    %164 = vector.shape_cast %163 : vector<2x8xf32> to vector<2x8x1xf32>
    %165 = vector.broadcast %164 : vector<2x8x1xf32> to vector<2x8x8xf32>
    %166 = arith.subf %162, %165 : vector<2x8x8xf32>
    %167 = math.exp %166 : vector<2x8x8xf32>
    %cst_45 = arith.constant dense<0.000000e+00> : vector<2x8xf32>
    %168 = vector.multi_reduction <add>, %167, %cst_45 [2] : vector<2x8x8xf32> to vector<2x8xf32>
    %169 = vector.shape_cast %168 : vector<2x8xf32> to vector<2x8x1xf32>
    %170 = vector.broadcast %169 : vector<2x8x1xf32> to vector<2x8x8xf32>
    %171 = arith.divf %167, %170 : vector<2x8x8xf32>
    %cst_46 = arith.constant 0.000000e+00 : f32
    %172 = vector.shape_cast %4 : vector<2x1x8xi1> to vector<2x1x8xi1>
    %173 = vector.broadcast %172 : vector<2x1x8xi1> to vector<2x8x8xi1>
    %174 = vector.broadcast %cst_46 : f32 to vector<2x8x8xf32>
    %175 = arith.select %173, %171, %174 : vector<2x8x8xi1>, vector<2x8x8xf32>
    "tpu.trace_start"() <{level = 10 : i32, message = "bts,bsk->btk"}> : () -> ()
    %cst_47 = arith.constant dense<0.000000e+00> : vector<2x8x8xf32>
    %176 = tpu.matmul %175, %150, %cst_47 {dimension_numbers = #tpu.dot_dimension_numbers<[2], [1], [1], [2], [0, 0, 0, 1, 1, 2], [0], [0]>} : vector<2x8x8xf32>, vector<2x8x8xf32>, vector<2x8x8xf32> -> vector<2x8x8xf32>
    "tpu.trace_stop"() : () -> ()
    %177 = vector.shape_cast %176 : vector<2x8x8xf32> to vector<16x8xf32>
    %178 = vector.extract_strided_slice %78 {offsets = [0, 24], sizes = [16, 8], strides = [1, 1]} : vector<16x128xf32> to vector<16x8xf32>
    %179 = vector.extract_strided_slice %78 {offsets = [0, 56], sizes = [16, 8], strides = [1, 1]} : vector<16x128xf32> to vector<16x8xf32>
    %180 = vector.extract_strided_slice %78 {offsets = [0, 88], sizes = [16, 8], strides = [1, 1]} : vector<16x128xf32> to vector<16x8xf32>
    %181 = vector.shape_cast %180 : vector<16x8xf32> to vector<2x8x8xf32>
    %182 = vector.extract_strided_slice %78 {offsets = [0, 120], sizes = [16, 8], strides = [1, 1]} : vector<16x128xf32> to vector<16x8xf32>
    %183 = vector.shape_cast %182 : vector<16x8xf32> to vector<2x8x8xf32>
    %184 = vector.extract_strided_slice %7 {offsets = [0, 24], sizes = [8, 8], strides = [1, 1]} : vector<8x32xf32> to vector<8x8xf32>
    %185 = tpu.concatenate %178, %179 in 1 : vector<16x8xf32>, vector<16x8xf32> -> vector<16x16xf32>
    %186 = vector.shape_cast %185 : vector<16x16xf32> to vector<2x8x16xf32>
    %187 = vector.shape_cast %184 : vector<8x8xf32> to vector<1x8x8xf32>
    %188 = vector.shape_cast %187 : vector<1x8x8xf32> to vector<1x8x8xf32>
    %189 = vector.broadcast %188 : vector<1x8x8xf32> to vector<2x8x8xf32>
    %190 = tpu.concatenate %181, %189 in 2 : vector<2x8x8xf32>, vector<2x8x8xf32> -> vector<2x8x16xf32>
    "tpu.trace_start"() <{level = 10 : i32, message = "btk,bsk->bts"}> : () -> ()
    %cst_48 = arith.constant dense<0.000000e+00> : vector<2x8x8xf32>
    %191 = tpu.matmul %186, %190, %cst_48 {dimension_numbers = #tpu.dot_dimension_numbers<[2], [2], [1], [1], [0, 0, 0, 1, 1, 1], [0], [0]>} : vector<2x8x16xf32>, vector<2x8x16xf32>, vector<2x8x8xf32> -> vector<2x8x8xf32>
    %cst_49 = arith.constant -1.000000e+30 : f32
    "tpu.trace_stop"() : () -> ()
    %192 = vector.shape_cast %4 : vector<2x1x8xi1> to vector<2x1x8xi1>
    %193 = vector.broadcast %192 : vector<2x1x8xi1> to vector<2x8x8xi1>
    %194 = vector.broadcast %cst_49 : f32 to vector<2x8x8xf32>
    %195 = arith.select %193, %191, %194 : vector<2x8x8xi1>, vector<2x8x8xf32>
    %cst_50 = arith.constant dense<0xFF800000> : vector<2x8xf32>
    %196 = vector.multi_reduction <maximumf>, %195, %cst_50 [2] : vector<2x8x8xf32> to vector<2x8xf32>
    %197 = vector.shape_cast %196 : vector<2x8xf32> to vector<2x8x1xf32>
    %198 = vector.broadcast %197 : vector<2x8x1xf32> to vector<2x8x8xf32>
    %199 = arith.subf %195, %198 : vector<2x8x8xf32>
    %200 = math.exp %199 : vector<2x8x8xf32>
    %cst_51 = arith.constant dense<0.000000e+00> : vector<2x8xf32>
    %201 = vector.multi_reduction <add>, %200, %cst_51 [2] : vector<2x8x8xf32> to vector<2x8xf32>
    %202 = vector.shape_cast %201 : vector<2x8xf32> to vector<2x8x1xf32>
    %203 = vector.broadcast %202 : vector<2x8x1xf32> to vector<2x8x8xf32>
    %204 = arith.divf %200, %203 : vector<2x8x8xf32>
    %cst_52 = arith.constant 0.000000e+00 : f32
    %205 = vector.shape_cast %4 : vector<2x1x8xi1> to vector<2x1x8xi1>
    %206 = vector.broadcast %205 : vector<2x1x8xi1> to vector<2x8x8xi1>
    %207 = vector.broadcast %cst_52 : f32 to vector<2x8x8xf32>
    %208 = arith.select %206, %204, %207 : vector<2x8x8xi1>, vector<2x8x8xf32>
    "tpu.trace_start"() <{level = 10 : i32, message = "bts,bsk->btk"}> : () -> ()
    %cst_53 = arith.constant dense<0.000000e+00> : vector<2x8x8xf32>
    %209 = tpu.matmul %208, %183, %cst_53 {dimension_numbers = #tpu.dot_dimension_numbers<[2], [1], [1], [2], [0, 0, 0, 1, 1, 2], [0], [0]>} : vector<2x8x8xf32>, vector<2x8x8xf32>, vector<2x8x8xf32> -> vector<2x8x8xf32>
    "tpu.trace_stop"() : () -> ()
    %210 = vector.shape_cast %209 : vector<2x8x8xf32> to vector<16x8xf32>
    %211 = tpu.concatenate %111, %144, %177, %210 in 1 : vector<16x8xf32>, vector<16x8xf32>, vector<16x8xf32>, vector<16x8xf32> -> vector<16x32xf32>
    %c0_54 = arith.constant 0 : index
    %c256 = arith.constant 256 : index
    %212 = vector.load %arg5[%c0_54, %c256] : memref<64x1024xf32, #tpu.memory_space<vmem>>, vector<32x32xf32>
    %cst_55 = arith.constant dense<0.000000e+00> : vector<16x32xf32>
    %213 = tpu.matmul %211, %212, %cst_55 {dimension_numbers = #tpu.dot_dimension_numbers<[1], [0], [0], [1], [0, 0, 1, 1], [], []>} : vector<16x32xf32>, vector<32x32xf32>, vector<16x32xf32> -> vector<16x32xf32>
    %214 = arith.addf %49, %213 : vector<16x32xf32>
    %215 = vector.extract_strided_slice %8 {offsets = [28, 0], sizes = [1, 32], strides = [1, 1]} : vector<34x128xf32> to vector<1x32xf32>
    %216 = vector.broadcast %215 : vector<1x32xf32> to vector<16x32xf32>
    %217 = arith.addf %214, %216 : vector<16x32xf32>
    %218 = vector.extract_strided_slice %8 {offsets = [19, 0], sizes = [1, 32], strides = [1, 1]} : vector<34x128xf32> to vector<1x32xf32>
    %219 = vector.extract_strided_slice %8 {offsets = [20, 0], sizes = [1, 32], strides = [1, 1]} : vector<34x128xf32> to vector<1x32xf32>
    %cst_56 = arith.constant dense<0.000000e+00> : vector<16xf32>
    %220 = vector.multi_reduction <add>, %217, %cst_56 [1] : vector<16x32xf32> to vector<16xf32>
    %221 = vector.shape_cast %220 : vector<16xf32> to vector<16x1xf32>
    %cst_57 = arith.constant 3.200000e+01 : f32
    %222 = vector.broadcast %cst_57 : f32 to vector<16x1xf32>
    %223 = arith.divf %221, %222 : vector<16x1xf32>
    %224 = vector.broadcast %223 : vector<16x1xf32> to vector<16x32xf32>
    %225 = arith.subf %217, %224 : vector<16x32xf32>
    %226 = arith.mulf %225, %225 : vector<16x32xf32>
    %cst_58 = arith.constant dense<0.000000e+00> : vector<16xf32>
    %227 = vector.multi_reduction <add>, %226, %cst_58 [1] : vector<16x32xf32> to vector<16xf32>
    %228 = vector.shape_cast %227 : vector<16xf32> to vector<16x1xf32>
    %cst_59 = arith.constant 3.200000e+01 : f32
    %229 = vector.broadcast %cst_59 : f32 to vector<16x1xf32>
    %230 = arith.divf %228, %229 : vector<16x1xf32>
    %231 = vector.broadcast %223 : vector<16x1xf32> to vector<16x32xf32>
    %232 = arith.subf %217, %231 : vector<16x32xf32>
    %cst_60 = arith.constant 9.99999996E-13 : f32
    %233 = vector.broadcast %cst_60 : f32 to vector<16x1xf32>
    %234 = arith.addf %230, %233 : vector<16x1xf32>
    %235 = math.rsqrt %234 : vector<16x1xf32>
    %236 = vector.broadcast %235 : vector<16x1xf32> to vector<16x32xf32>
    %237 = arith.mulf %232, %236 : vector<16x32xf32>
    %238 = vector.broadcast %218 : vector<1x32xf32> to vector<16x32xf32>
    %239 = arith.mulf %237, %238 : vector<16x32xf32>
    %240 = vector.broadcast %219 : vector<1x32xf32> to vector<16x32xf32>
    %241 = arith.addf %239, %240 : vector<16x32xf32>
    %242 = vector.broadcast %6 : vector<16x1xf32> to vector<16x32xf32>
    %243 = arith.mulf %241, %242 : vector<16x32xf32>
    %c0_61 = arith.constant 0 : index
    %c384 = arith.constant 384 : index
    %244 = vector.load %arg5[%c0_61, %c384] : memref<64x1024xf32, #tpu.memory_space<vmem>>, vector<32x64xf32>
    %cst_62 = arith.constant dense<0.000000e+00> : vector<16x64xf32>
    %245 = tpu.matmul %243, %244, %cst_62 {dimension_numbers = #tpu.dot_dimension_numbers<[1], [0], [0], [1], [0, 0, 1, 1], [], []>} : vector<16x32xf32>, vector<32x64xf32>, vector<16x64xf32> -> vector<16x64xf32>
    %246 = vector.extract_strided_slice %8 {offsets = [29, 0], sizes = [1, 64], strides = [1, 1]} : vector<34x128xf32> to vector<1x64xf32>
    %247 = vector.broadcast %246 : vector<1x64xf32> to vector<16x64xf32>
    %248 = arith.addf %245, %247 : vector<16x64xf32>
    %249 = vector.extract_strided_slice %248 {offsets = [0, 0], sizes = [16, 32], strides = [1, 1]} : vector<16x64xf32> to vector<16x32xf32>
    %250 = vector.extract_strided_slice %248 {offsets = [0, 32], sizes = [16, 32], strides = [1, 1]} : vector<16x64xf32> to vector<16x32xf32>
    %251 = arith.negf %250 : vector<16x32xf32>
    %252 = math.exp %251 : vector<16x32xf32>
    %cst_63 = arith.constant 1.000000e+00 : f32
    %253 = vector.broadcast %cst_63 : f32 to vector<16x32xf32>
    %254 = arith.addf %253, %252 : vector<16x32xf32>
    %255 = arith.divf %253, %254 : vector<16x32xf32>
    %256 = arith.mulf %249, %255 : vector<16x32xf32>
    %257 = vector.shape_cast %256 : vector<16x32xf32> to vector<2x8x32xf32>
    %cst_64 = arith.constant 0.000000e+00 : f32
    %258 = vector.broadcast %cst_64 : f32 to vector<2x7x32xf32>
    %259 = tpu.concatenate %258, %257, %258 in 1 : vector<2x7x32xf32>, vector<2x8x32xf32>, vector<2x7x32xf32> -> vector<2x22x32xf32>
    %260 = vector.extract_strided_slice %8 {offsets = [0, 0], sizes = [15, 32], strides = [1, 1]} : vector<34x128xf32> to vector<15x32xf32>
    %261 = vector.extract_strided_slice %259 {offsets = [0, 0, 0], sizes = [2, 8, 32], strides = [1, 1, 1]} : vector<2x22x32xf32> to vector<2x8x32xf32>
    %262 = vector.extract_strided_slice %260 {offsets = [0, 0], sizes = [1, 32], strides = [1, 1]} : vector<15x32xf32> to vector<1x32xf32>
    %263 = vector.shape_cast %262 : vector<1x32xf32> to vector<1x1x32xf32>
    %264 = vector.broadcast %263 : vector<1x1x32xf32> to vector<2x8x32xf32>
    %265 = arith.mulf %261, %264 : vector<2x8x32xf32>
    %266 = vector.extract_strided_slice %259 {offsets = [0, 1, 0], sizes = [2, 8, 32], strides = [1, 1, 1]} : vector<2x22x32xf32> to vector<2x8x32xf32>
    %267 = vector.extract_strided_slice %260 {offsets = [1, 0], sizes = [1, 32], strides = [1, 1]} : vector<15x32xf32> to vector<1x32xf32>
    %268 = vector.shape_cast %267 : vector<1x32xf32> to vector<1x1x32xf32>
    %269 = vector.broadcast %268 : vector<1x1x32xf32> to vector<2x8x32xf32>
    %270 = arith.mulf %266, %269 : vector<2x8x32xf32>
    %271 = arith.addf %265, %270 : vector<2x8x32xf32>
    %272 = vector.extract_strided_slice %259 {offsets = [0, 2, 0], sizes = [2, 8, 32], strides = [1, 1, 1]} : vector<2x22x32xf32> to vector<2x8x32xf32>
    %273 = vector.extract_strided_slice %260 {offsets = [2, 0], sizes = [1, 32], strides = [1, 1]} : vector<15x32xf32> to vector<1x32xf32>
    %274 = vector.shape_cast %273 : vector<1x32xf32> to vector<1x1x32xf32>
    %275 = vector.broadcast %274 : vector<1x1x32xf32> to vector<2x8x32xf32>
    %276 = arith.mulf %272, %275 : vector<2x8x32xf32>
    %277 = arith.addf %271, %276 : vector<2x8x32xf32>
    %278 = vector.extract_strided_slice %259 {offsets = [0, 3, 0], sizes = [2, 8, 32], strides = [1, 1, 1]} : vector<2x22x32xf32> to vector<2x8x32xf32>
    %279 = vector.extract_strided_slice %260 {offsets = [3, 0], sizes = [1, 32], strides = [1, 1]} : vector<15x32xf32> to vector<1x32xf32>
    %280 = vector.shape_cast %279 : vector<1x32xf32> to vector<1x1x32xf32>
    %281 = vector.broadcast %280 : vector<1x1x32xf32> to vector<2x8x32xf32>
    %282 = arith.mulf %278, %281 : vector<2x8x32xf32>
    %283 = arith.addf %277, %282 : vector<2x8x32xf32>
    %284 = vector.extract_strided_slice %259 {offsets = [0, 4, 0], sizes = [2, 8, 32], strides = [1, 1, 1]} : vector<2x22x32xf32> to vector<2x8x32xf32>
    %285 = vector.extract_strided_slice %260 {offsets = [4, 0], sizes = [1, 32], strides = [1, 1]} : vector<15x32xf32> to vector<1x32xf32>
    %286 = vector.shape_cast %285 : vector<1x32xf32> to vector<1x1x32xf32>
    %287 = vector.broadcast %286 : vector<1x1x32xf32> to vector<2x8x32xf32>
    %288 = arith.mulf %284, %287 : vector<2x8x32xf32>
    %289 = arith.addf %283, %288 : vector<2x8x32xf32>
    %290 = vector.extract_strided_slice %259 {offsets = [0, 5, 0], sizes = [2, 8, 32], strides = [1, 1, 1]} : vector<2x22x32xf32> to vector<2x8x32xf32>
    %291 = vector.extract_strided_slice %260 {offsets = [5, 0], sizes = [1, 32], strides = [1, 1]} : vector<15x32xf32> to vector<1x32xf32>
    %292 = vector.shape_cast %291 : vector<1x32xf32> to vector<1x1x32xf32>
    %293 = vector.broadcast %292 : vector<1x1x32xf32> to vector<2x8x32xf32>
    %294 = arith.mulf %290, %293 : vector<2x8x32xf32>
    %295 = arith.addf %289, %294 : vector<2x8x32xf32>
    %296 = vector.extract_strided_slice %259 {offsets = [0, 6, 0], sizes = [2, 8, 32], strides = [1, 1, 1]} : vector<2x22x32xf32> to vector<2x8x32xf32>
    %297 = vector.extract_strided_slice %260 {offsets = [6, 0], sizes = [1, 32], strides = [1, 1]} : vector<15x32xf32> to vector<1x32xf32>
    %298 = vector.shape_cast %297 : vector<1x32xf32> to vector<1x1x32xf32>
    %299 = vector.broadcast %298 : vector<1x1x32xf32> to vector<2x8x32xf32>
    %300 = arith.mulf %296, %299 : vector<2x8x32xf32>
    %301 = arith.addf %295, %300 : vector<2x8x32xf32>
    %302 = vector.extract_strided_slice %259 {offsets = [0, 7, 0], sizes = [2, 8, 32], strides = [1, 1, 1]} : vector<2x22x32xf32> to vector<2x8x32xf32>
    %303 = vector.extract_strided_slice %260 {offsets = [7, 0], sizes = [1, 32], strides = [1, 1]} : vector<15x32xf32> to vector<1x32xf32>
    %304 = vector.shape_cast %303 : vector<1x32xf32> to vector<1x1x32xf32>
    %305 = vector.broadcast %304 : vector<1x1x32xf32> to vector<2x8x32xf32>
    %306 = arith.mulf %302, %305 : vector<2x8x32xf32>
    %307 = arith.addf %301, %306 : vector<2x8x32xf32>
    %308 = vector.extract_strided_slice %259 {offsets = [0, 8, 0], sizes = [2, 8, 32], strides = [1, 1, 1]} : vector<2x22x32xf32> to vector<2x8x32xf32>
    %309 = vector.extract_strided_slice %260 {offsets = [8, 0], sizes = [1, 32], strides = [1, 1]} : vector<15x32xf32> to vector<1x32xf32>
    %310 = vector.shape_cast %309 : vector<1x32xf32> to vector<1x1x32xf32>
    %311 = vector.broadcast %310 : vector<1x1x32xf32> to vector<2x8x32xf32>
    %312 = arith.mulf %308, %311 : vector<2x8x32xf32>
    %313 = arith.addf %307, %312 : vector<2x8x32xf32>
    %314 = vector.extract_strided_slice %259 {offsets = [0, 9, 0], sizes = [2, 8, 32], strides = [1, 1, 1]} : vector<2x22x32xf32> to vector<2x8x32xf32>
    %315 = vector.extract_strided_slice %260 {offsets = [9, 0], sizes = [1, 32], strides = [1, 1]} : vector<15x32xf32> to vector<1x32xf32>
    %316 = vector.shape_cast %315 : vector<1x32xf32> to vector<1x1x32xf32>
    %317 = vector.broadcast %316 : vector<1x1x32xf32> to vector<2x8x32xf32>
    %318 = arith.mulf %314, %317 : vector<2x8x32xf32>
    %319 = arith.addf %313, %318 : vector<2x8x32xf32>
    %320 = vector.extract_strided_slice %259 {offsets = [0, 10, 0], sizes = [2, 8, 32], strides = [1, 1, 1]} : vector<2x22x32xf32> to vector<2x8x32xf32>
    %321 = vector.extract_strided_slice %260 {offsets = [10, 0], sizes = [1, 32], strides = [1, 1]} : vector<15x32xf32> to vector<1x32xf32>
    %322 = vector.shape_cast %321 : vector<1x32xf32> to vector<1x1x32xf32>
    %323 = vector.broadcast %322 : vector<1x1x32xf32> to vector<2x8x32xf32>
    %324 = arith.mulf %320, %323 : vector<2x8x32xf32>
    %325 = arith.addf %319, %324 : vector<2x8x32xf32>
    %326 = vector.extract_strided_slice %259 {offsets = [0, 11, 0], sizes = [2, 8, 32], strides = [1, 1, 1]} : vector<2x22x32xf32> to vector<2x8x32xf32>
    %327 = vector.extract_strided_slice %260 {offsets = [11, 0], sizes = [1, 32], strides = [1, 1]} : vector<15x32xf32> to vector<1x32xf32>
    %328 = vector.shape_cast %327 : vector<1x32xf32> to vector<1x1x32xf32>
    %329 = vector.broadcast %328 : vector<1x1x32xf32> to vector<2x8x32xf32>
    %330 = arith.mulf %326, %329 : vector<2x8x32xf32>
    %331 = arith.addf %325, %330 : vector<2x8x32xf32>
    %332 = vector.extract_strided_slice %259 {offsets = [0, 12, 0], sizes = [2, 8, 32], strides = [1, 1, 1]} : vector<2x22x32xf32> to vector<2x8x32xf32>
    %333 = vector.extract_strided_slice %260 {offsets = [12, 0], sizes = [1, 32], strides = [1, 1]} : vector<15x32xf32> to vector<1x32xf32>
    %334 = vector.shape_cast %333 : vector<1x32xf32> to vector<1x1x32xf32>
    %335 = vector.broadcast %334 : vector<1x1x32xf32> to vector<2x8x32xf32>
    %336 = arith.mulf %332, %335 : vector<2x8x32xf32>
    %337 = arith.addf %331, %336 : vector<2x8x32xf32>
    %338 = vector.extract_strided_slice %259 {offsets = [0, 13, 0], sizes = [2, 8, 32], strides = [1, 1, 1]} : vector<2x22x32xf32> to vector<2x8x32xf32>
    %339 = vector.extract_strided_slice %260 {offsets = [13, 0], sizes = [1, 32], strides = [1, 1]} : vector<15x32xf32> to vector<1x32xf32>
    %340 = vector.shape_cast %339 : vector<1x32xf32> to vector<1x1x32xf32>
    %341 = vector.broadcast %340 : vector<1x1x32xf32> to vector<2x8x32xf32>
    %342 = arith.mulf %338, %341 : vector<2x8x32xf32>
    %343 = arith.addf %337, %342 : vector<2x8x32xf32>
    %344 = vector.extract_strided_slice %259 {offsets = [0, 14, 0], sizes = [2, 8, 32], strides = [1, 1, 1]} : vector<2x22x32xf32> to vector<2x8x32xf32>
    %345 = vector.extract_strided_slice %260 {offsets = [14, 0], sizes = [1, 32], strides = [1, 1]} : vector<15x32xf32> to vector<1x32xf32>
    %346 = vector.shape_cast %345 : vector<1x32xf32> to vector<1x1x32xf32>
    %347 = vector.broadcast %346 : vector<1x1x32xf32> to vector<2x8x32xf32>
    %348 = arith.mulf %344, %347 : vector<2x8x32xf32>
    %349 = arith.addf %343, %348 : vector<2x8x32xf32>
    %350 = vector.shape_cast %349 : vector<2x8x32xf32> to vector<16x32xf32>
    %351 = vector.extract_strided_slice %8 {offsets = [30, 0], sizes = [1, 32], strides = [1, 1]} : vector<34x128xf32> to vector<1x32xf32>
    %352 = vector.broadcast %351 : vector<1x32xf32> to vector<16x32xf32>
    %353 = arith.addf %350, %352 : vector<16x32xf32>
    %354 = arith.negf %353 : vector<16x32xf32>
    %355 = math.exp %354 : vector<16x32xf32>
    %cst_65 = arith.constant 1.000000e+00 : f32
    %356 = vector.broadcast %cst_65 : f32 to vector<16x32xf32>
    %357 = arith.addf %356, %355 : vector<16x32xf32>
    %358 = arith.divf %356, %357 : vector<16x32xf32>
    %359 = arith.mulf %353, %358 : vector<16x32xf32>
    %c0_66 = arith.constant 0 : index
    %c512 = arith.constant 512 : index
    %360 = vector.load %arg5[%c0_66, %c512] : memref<64x1024xf32, #tpu.memory_space<vmem>>, vector<32x32xf32>
    %cst_67 = arith.constant dense<0.000000e+00> : vector<16x32xf32>
    %361 = tpu.matmul %359, %360, %cst_67 {dimension_numbers = #tpu.dot_dimension_numbers<[1], [0], [0], [1], [0, 0, 1, 1], [], []>} : vector<16x32xf32>, vector<32x32xf32>, vector<16x32xf32> -> vector<16x32xf32>
    %362 = vector.extract_strided_slice %8 {offsets = [31, 0], sizes = [1, 32], strides = [1, 1]} : vector<34x128xf32> to vector<1x32xf32>
    %363 = vector.broadcast %362 : vector<1x32xf32> to vector<16x32xf32>
    %364 = arith.addf %361, %363 : vector<16x32xf32>
    %365 = vector.broadcast %6 : vector<16x1xf32> to vector<16x32xf32>
    %366 = arith.mulf %364, %365 : vector<16x32xf32>
    %367 = arith.addf %217, %366 : vector<16x32xf32>
    %368 = vector.extract_strided_slice %8 {offsets = [21, 0], sizes = [1, 32], strides = [1, 1]} : vector<34x128xf32> to vector<1x32xf32>
    %369 = vector.extract_strided_slice %8 {offsets = [22, 0], sizes = [1, 32], strides = [1, 1]} : vector<34x128xf32> to vector<1x32xf32>
    %cst_68 = arith.constant dense<0.000000e+00> : vector<16xf32>
    %370 = vector.multi_reduction <add>, %367, %cst_68 [1] : vector<16x32xf32> to vector<16xf32>
    %371 = vector.shape_cast %370 : vector<16xf32> to vector<16x1xf32>
    %cst_69 = arith.constant 3.200000e+01 : f32
    %372 = vector.broadcast %cst_69 : f32 to vector<16x1xf32>
    %373 = arith.divf %371, %372 : vector<16x1xf32>
    %374 = vector.broadcast %373 : vector<16x1xf32> to vector<16x32xf32>
    %375 = arith.subf %367, %374 : vector<16x32xf32>
    %376 = arith.mulf %375, %375 : vector<16x32xf32>
    %cst_70 = arith.constant dense<0.000000e+00> : vector<16xf32>
    %377 = vector.multi_reduction <add>, %376, %cst_70 [1] : vector<16x32xf32> to vector<16xf32>
    %378 = vector.shape_cast %377 : vector<16xf32> to vector<16x1xf32>
    %cst_71 = arith.constant 3.200000e+01 : f32
    %379 = vector.broadcast %cst_71 : f32 to vector<16x1xf32>
    %380 = arith.divf %378, %379 : vector<16x1xf32>
    %381 = vector.broadcast %373 : vector<16x1xf32> to vector<16x32xf32>
    %382 = arith.subf %367, %381 : vector<16x32xf32>
    %cst_72 = arith.constant 9.99999996E-13 : f32
    %383 = vector.broadcast %cst_72 : f32 to vector<16x1xf32>
    %384 = arith.addf %380, %383 : vector<16x1xf32>
    %385 = math.rsqrt %384 : vector<16x1xf32>
    %386 = vector.broadcast %385 : vector<16x1xf32> to vector<16x32xf32>
    %387 = arith.mulf %382, %386 : vector<16x32xf32>
    %388 = vector.broadcast %368 : vector<1x32xf32> to vector<16x32xf32>
    %389 = arith.mulf %387, %388 : vector<16x32xf32>
    %390 = vector.broadcast %369 : vector<1x32xf32> to vector<16x32xf32>
    %391 = arith.addf %389, %390 : vector<16x32xf32>
    %c0_73 = arith.constant 0 : index
    %c640 = arith.constant 640 : index
    %392 = vector.load %arg5[%c0_73, %c640] : memref<64x1024xf32, #tpu.memory_space<vmem>>, vector<32x64xf32>
    %cst_74 = arith.constant dense<0.000000e+00> : vector<16x64xf32>
    %393 = tpu.matmul %391, %392, %cst_74 {dimension_numbers = #tpu.dot_dimension_numbers<[1], [0], [0], [1], [0, 0, 1, 1], [], []>} : vector<16x32xf32>, vector<32x64xf32>, vector<16x64xf32> -> vector<16x64xf32>
    %394 = vector.extract_strided_slice %8 {offsets = [32, 0], sizes = [1, 64], strides = [1, 1]} : vector<34x128xf32> to vector<1x64xf32>
    %395 = vector.broadcast %394 : vector<1x64xf32> to vector<16x64xf32>
    %396 = arith.addf %393, %395 : vector<16x64xf32>
    %397 = arith.negf %396 : vector<16x64xf32>
    %398 = math.exp %397 : vector<16x64xf32>
    %cst_75 = arith.constant 1.000000e+00 : f32
    %399 = vector.broadcast %cst_75 : f32 to vector<16x64xf32>
    %400 = arith.addf %399, %398 : vector<16x64xf32>
    %401 = arith.divf %399, %400 : vector<16x64xf32>
    %402 = arith.mulf %396, %401 : vector<16x64xf32>
    %c0_76 = arith.constant 0 : index
    %c896 = arith.constant 896 : index
    %403 = vector.load %arg5[%c0_76, %c896] : memref<64x1024xf32, #tpu.memory_space<vmem>>, vector<64x32xf32>
    %cst_77 = arith.constant dense<0.000000e+00> : vector<16x32xf32>
    %404 = tpu.matmul %402, %403, %cst_77 {dimension_numbers = #tpu.dot_dimension_numbers<[1], [0], [0], [1], [0, 0, 1, 1], [], []>} : vector<16x64xf32>, vector<64x32xf32>, vector<16x32xf32> -> vector<16x32xf32>
    %405 = arith.addf %367, %404 : vector<16x32xf32>
    %406 = vector.extract_strided_slice %8 {offsets = [33, 0], sizes = [1, 32], strides = [1, 1]} : vector<34x128xf32> to vector<1x32xf32>
    %407 = vector.broadcast %406 : vector<1x32xf32> to vector<16x32xf32>
    %408 = arith.addf %405, %407 : vector<16x32xf32>
    %409 = vector.extract_strided_slice %8 {offsets = [23, 0], sizes = [1, 32], strides = [1, 1]} : vector<34x128xf32> to vector<1x32xf32>
    %410 = vector.extract_strided_slice %8 {offsets = [24, 0], sizes = [1, 32], strides = [1, 1]} : vector<34x128xf32> to vector<1x32xf32>
    %cst_78 = arith.constant dense<0.000000e+00> : vector<16xf32>
    %411 = vector.multi_reduction <add>, %408, %cst_78 [1] : vector<16x32xf32> to vector<16xf32>
    %412 = vector.shape_cast %411 : vector<16xf32> to vector<16x1xf32>
    %cst_79 = arith.constant 3.200000e+01 : f32
    %413 = vector.broadcast %cst_79 : f32 to vector<16x1xf32>
    %414 = arith.divf %412, %413 : vector<16x1xf32>
    %415 = vector.broadcast %414 : vector<16x1xf32> to vector<16x32xf32>
    %416 = arith.subf %408, %415 : vector<16x32xf32>
    %417 = arith.mulf %416, %416 : vector<16x32xf32>
    %cst_80 = arith.constant dense<0.000000e+00> : vector<16xf32>
    %418 = vector.multi_reduction <add>, %417, %cst_80 [1] : vector<16x32xf32> to vector<16xf32>
    %419 = vector.shape_cast %418 : vector<16xf32> to vector<16x1xf32>
    %cst_81 = arith.constant 3.200000e+01 : f32
    %420 = vector.broadcast %cst_81 : f32 to vector<16x1xf32>
    %421 = arith.divf %419, %420 : vector<16x1xf32>
    %422 = vector.broadcast %414 : vector<16x1xf32> to vector<16x32xf32>
    %423 = arith.subf %408, %422 : vector<16x32xf32>
    %cst_82 = arith.constant 9.99999996E-13 : f32
    %424 = vector.broadcast %cst_82 : f32 to vector<16x1xf32>
    %425 = arith.addf %421, %424 : vector<16x1xf32>
    %426 = math.rsqrt %425 : vector<16x1xf32>
    %427 = vector.broadcast %426 : vector<16x1xf32> to vector<16x32xf32>
    %428 = arith.mulf %423, %427 : vector<16x32xf32>
    %429 = vector.broadcast %409 : vector<1x32xf32> to vector<16x32xf32>
    %430 = arith.mulf %428, %429 : vector<16x32xf32>
    %431 = vector.broadcast %410 : vector<1x32xf32> to vector<16x32xf32>
    %432 = arith.addf %430, %431 : vector<16x32xf32>
    %433 = vector.shape_cast %432 : vector<16x32xf32> to vector<2x8x32xf32>
    %c0_83 = arith.constant 0 : index
    %c0_84 = arith.constant 0 : index
    %c0_85 = arith.constant 0 : index
    %434 = vector.load %arg6[%c0_83, %c0_84, %c0_85] : memref<2x8x32xf32, #tpu.memory_space<vmem>>, vector<2x8x32xf32>
    tpu.vector_store %arg6[%c0_83, %c0_84, %c0_85], %433 {strides = array<i32>} : memref<2x8x32xf32, #tpu.memory_space<vmem>>, vector<2x8x32xf32>,
    return
  }
}

</mosaic_0001>

<bundles_post_ra>
// kernel: tpu_custom_call.1
= control target key start
LH: loop header
LB: loop body
LE: loop exit
PB: predicated region body
PF: predicated region fallthrough
CT: control target
= control target key end

     0   :  { %11 = vsyncpa [#allocation3], 0  ;;  %s2791_s0 = inlined_call_operand.vmem [shape: f32[2,8,32], index: 0, kind: input, shape index: {}]   ;;  %s2792_s1 = inlined_call_operand.vmem [shape: f32[2,1,8], index: 1, kind: input, shape index: {}]   ;;  %s2793_s2 = inlined_call_operand.vmem [shape: f32[2,8,1], index: 2, kind: input, shape index: {}]   ;;  %s2794_s3 = inlined_call_operand.hbm [shape: f32[8,32], index: 3, kind: input, shape index: {}]   ;;  %s2795_s4 = inlined_call_operand.hbm [shape: f32[34,128], index: 4, kind: input, shape index: {}]   ;;  %s2796_s5 = inlined_call_operand.hbm [shape: f32[64,1024], index: 5, kind: input, shape index: {}]   ;;  %s2797_s6 = inlined_call_operand.hbm [shape: f32[2,8,32], index: 6, kind: output, shape index: {}]  }
   0x1   :  { %12 = vsyncpa [#allocation6], 0  ;;  %s35_s23 = sshll.u32 %s2795_s4, 4  ;;  %s36_s23 = int_to_ptr.hbm [resolvable:$true] %s35_s23 }
   0x2   :  { %13 = vsyncpa [#allocation4], 0  ;;  %s2117_s24 = smov [#allocation5]   ;;  %s25_s28 = sshll.u32 %s2794_s3, 4  ;;  %s26_s28 = int_to_ptr.hbm [resolvable:$true] %s25_s28 }
   0x3   :  { %s37_s25 = sshll.u32 %s2117_s24, 4  ;;  %s2118_s29 = smov 128   ;;  %s38_s25 = int_to_ptr.vmem [resolvable:$true] %s37_s25 }
   0x4   :  { %s2119_s30 = smov 8   ;;  %s2120_s7 = smov [#allocation2]  }
   0x5   :  { %43 = dma.hbm_to_vmem [thread:$0]  %s36_s23, 640, %s38_s25, [#allocation6], %s2118_s29, %s2118_s29, %s2119_s30  }
   0x6   :  { %s27_s8 = sshll.u32 %s2120_s7, 4  ;;  %s48_s10 = sshll.u32 %s2796_s5, 4  ;;  %s28_s8 = int_to_ptr.vmem [resolvable:$true] %s27_s8  ;;  %s49_s10 = int_to_ptr.hbm [resolvable:$true] %s48_s10 }
   0x7   :  { %30 = dma.hbm_to_vmem [thread:$0]  %s26_s28, 128, %s28_s8, [#allocation3]  }
   0x8   :  { %s2121_s11 = smov [#allocation7]   ;;  %s2122_s3 = smov 1024  }
   0x9   :  { %s50_s12 = sshll.u32 %s2121_s11, 4  ;;  %s2123_s13 = smov 64   ;;  %s51_s12 = int_to_ptr.vmem [resolvable:$true] %s50_s12 }
   0xa   :  { %56 = dma.hbm_to_vmem [thread:$0]  %s49_s10, 8192, %s51_s12, [#allocation6], %s2122_s3, %s2122_s3, %s2123_s13  }
   0xb   :  { %2111 = dma.done.wait [#allocation3], 128  }
   0xc   :  { %2112 = vsyncadd [#allocation3], 4294967168 }
   0xd   :  { %2113 = dma.done.wait [#allocation6], 8832  }
   0xe   :  { %2114 = vsyncadd [#allocation6], 4294958464  ;;  %vm83_vm0 = vcmask 261120   ;;  %v2190_v0 = vld [vmem:[%s2791_s0] sm:$0xff]  ;;  %v2195_v1 = vld [vmem:[%s2791_s0 + $0x8] sm:$0xff]  ;;  %v2124_v4 = vmov 32.0  }
   0xf   :  { %v84_v2 = vsel %vm83_vm0, %v2190_v0, 0.0  ;;  %v87_v3 = vsel %vm83_vm0, %v2195_v1, 0.0  ;;  %1925 = vrcp.f32 %v2124_v4  ;;  %v144_v21 = vld [vmem:[#allocation7 + $0xc0] sm:$0xff]  ;;  %v2211_v43 = vld [vmem:[#allocation5 + $0x10] sm:$0xff]  ;;  %v222_v55 = vld [vmem:[#allocation7 + $0x1f0] sm:$0xff]  ;;  %vm223_vm12 = vcmask 523264  }
  0x10   :  { %85 = vadd.xlane.f32.xlu0 %v84_v2  ;;  %88 = vadd.xlane.f32.xlu1 %v87_v3  ;;  %v143_v22 = vld [vmem:[#allocation7 + $0x80] sm:$0xff]  ;;  %v138_v48 = vperm.slane %v2211_v43, 0  ;;  %v221_v56 = vld [vmem:[#allocation7 + $0x1b0] sm:$0xff]  ;;  %s2125_s0 = smov 104   ;;  %s2126_s17 = smov 32  }
  0x11   :  { %164 = vmatpush.msra.mxu0 %v144_v21  ;;  %v142_v23 = vld [vmem:[#allocation7 + $0x40] sm:$0xff]  ;;  %238 = vmatpush.msra.mxu1 %v222_v55  ;;  %v220_v57 = vld [vmem:[#allocation7 + $0x170] sm:$0xff]  ;;  %v311_v55 = vld [vmem:[#allocation7 + $0xc8] sm:$0xff]  ;;  %s2127_s18 = smov 120   ;;  %s2128_s19 = smov 48  }
  0x12   :  { %v141_v24 = vld [vmem:[#allocation7] sm:$0xff]  ;;  %v219_v58 = vld [vmem:[#allocation7 + $0x130] sm:$0xff]  ;;  %331 = vmatpush.msra.mxu2 %v311_v55  ;;  %s2129_s20 = smov 96   ;;  %s2130_s21 = smov 56  }
  0x13   :  { %165 = vmatpush.msra.mxu0 %v143_v22  ;;  %v79_v40 = vld [vmem:[#allocation5 + $0x8] sm:$0xff]  ;;  %239 = vmatpush.msra.mxu1 %v221_v56  ;;  %v218_v59 = vld [vmem:[#allocation7 + $0xf0] sm:$0xff]  ;;  %v310_v56 = vld [vmem:[#allocation7 + $0x88] sm:$0xff]  ;;  %s2131_s22 = smov 88   ;;  %s2132_s23 = smov 112  }
  0x14   :  { %v135_v44 = vperm.slane %v79_v40, 7  ;;  %v2216_v60 = vld [vmem:[#allocation5 + $0x18] sm:$0xff]  ;;  %332 = vmatpush.msra.mxu2 %v310_v56  ;;  %s2133_s24 = smov 80   ;;  %s2135_s27 = smov 40  }
  0x15   :  { %v1926_v5 = vpop.eup %1925  ;;  %166 = vmatpush.msra.mxu0 %v142_v23  ;;  %240 = vmatpush.msra.mxu1 %v220_v57  ;;  %v217_v61 = vld [vmem:[#allocation7 + $0xb0] sm:$0xff]  ;;  %v145_v62 = vperm.slane %v2216_v60, 1  ;;  %v309_v57 = vld [vmem:[#allocation7 + $0x48] sm:$0xff]  ;;  %s2137_s8 = smov 16   ;;  %s1834_s14 = sshll.u32 %s2797_s6, 4  ;;  %s1835_s14 = int_to_ptr.hbm [resolvable:$true] %s1834_s14 }
  0x16   :  { %v91_v6 = vmul.f32 32.0, %v1926_v5  ;;  %vm95_vm1 = vweird.f32 %v1926_v5  ;;  %v216_v63 = vld [vmem:[#allocation7 + $0x70] sm:$0xff]  ;;  %333 = vmatpush.msra.mxu2 %v309_v57 }
  0x17   :  { %167 = vmatpush.msra.mxu0 %v141_v24  ;;  %241 = vmatpush.msra.mxu1 %v219_v58  ;;  %v215_v2 = vld [vmem:[#allocation7 + $0x30] sm:$0xff]  ;;  %v308_v58 = vld [vmem:[#allocation7 + $0x8] sm:$0xff] }
  0x18   :  { %v92_v7 = vsub.f32 1.0, %v91_v6  ;;  %334 = vmatpush.msra.mxu2 %v308_v58 }
  0x19   :  { %242 = vmatpush.msra.mxu1 %v218_v59 }
  0x1a   :  { %v93_v8 = vmul.f32 %v1926_v5, %v92_v7 }
  0x1b   :  { %243 = vmatpush.msra.mxu1 %v217_v61 }
  0x1c   :  { %v94_v9 = vadd.f32 %v1926_v5, %v93_v8 }
  0x1d   :  { %244 = vmatpush.msra.mxu1 %v216_v63 }
  0x1e   :  { %v2201_v10 = vsel %vm95_vm1, %v1926_v5, %v94_v9 }
  0x1f   :  { %245 = vmatpush.msra.mxu1 %v215_v2 }
  0x83   :  { %v86_v11 = vpop.xlane.xlu0 %85  ;;  %v89_v12 = vpop.xlane.xlu1 %88 }
  0x84   :  { %v97_v13 = vmul.f32 %v2201_v10, %v86_v11  ;;  %v98_v14 = vmul.f32 %v2201_v10, %v89_v12 }
  0x86   :  { %v99_v15 = vsub.f32 %v2190_v0, %v97_v13  ;;  %v100_v16 = vsub.f32 %v2195_v1, %v98_v14 }
  0x88   :  { %v101_v17 = vmul.f32 %v99_v15, %v99_v15  ;;  %v102_v18 = vmul.f32 %v100_v16, %v100_v16 }
  0x8a   :  { %v103_v19 = vsel %vm83_vm0, %v101_v17, 0.0  ;;  %v106_v20 = vsel %vm83_vm0, %v102_v18, 0.0 }
  0x8b   :  { %104 = vadd.xlane.f32.xlu0 %v103_v19  ;;  %107 = vadd.xlane.f32.xlu1 %v106_v20 }
  0xfe   :  { %v105_v25 = vpop.xlane.xlu0 %104  ;;  %v108_v26 = vpop.xlane.xlu1 %107 }
  0xff   :  { %v109_v27 = vmul.f32 %v105_v25, %v2201_v10  ;;  %v110_v28 = vmul.f32 %v108_v26, %v2201_v10 }
 0x101   :  { %v111_v29 = vadd.f32 1e-12, %v109_v27  ;;  %v112_v30 = vadd.f32 1e-12, %v110_v28 }
 0x103   :  { %1927 = vrsqrt.f32 %v111_v29  ;;  %vm129_vm2 = vweird.f32 %v112_v30  ;;  %vm119_vm5 = vweird.f32 %v111_v29 }
 0x104   :  { %1929 = vrsqrt.f32 %v112_v30 }
 0x109   :  { %v1928_v31 = vpop.eup %1927 }
 0x10a   :  { %v1930_v32 = vpop.eup %1929  ;;  %v114_v33 = vmul.f32 %v1928_v31, %v111_v29  ;;  %vm120_vm4 = vweird.f32 %v1928_v31 }
 0x10b   :  { %v124_v34 = vmul.f32 %v1930_v32, %v112_v30  ;;  %vm130_vm3 = vweird.f32 %v1930_v32  ;;  %vm121_vm7 = vmor %vm119_vm5, %vm120_vm4 }
 0x10c   :  { %v115_v35 = vmul.f32 %v1928_v31, %v114_v33  ;;  %vm131_vm6 = vmor %vm129_vm2, %vm130_vm3 }
 0x10d   :  { %v125_v36 = vmul.f32 %v1930_v32, %v124_v34 }
 0x10e   :  { %v116_v37 = vmul.f32 0.5, %v115_v35 }
 0x10f   :  { %v126_v38 = vmul.f32 0.5, %v125_v36  ;;  %v255_v36 = vperm.slane %v2216_v60, 2 }
 0x110   :  { %v117_v39 = vsub.f32 1.5, %v116_v37 }
 0x111   :  { %v127_v41 = vsub.f32 1.5, %v126_v38 }
 0x112   :  { %v118_v42 = vmul.f32 %v1928_v31, %v117_v39 }
 0x113   :  { %v128_v45 = vmul.f32 %v1930_v32, %v127_v41 }
 0x114   :  { %v122_v46 = vsel %vm121_vm7, %v1928_v31, %v118_v42 }
 0x115   :  { %v133_v47 = vmul.f32 %v122_v46, %v99_v15  ;;  %v132_v49 = vsel %vm131_vm6, %v1930_v32, %v128_v45 }
 0x116   :  { %v134_v51 = vmul.f32 %v132_v49, %v100_v16 }
 0x117   :  { %v136_v50 = vmul.f32 %v135_v44, %v133_v47 }
 0x118   :  { %v137_v53 = vmul.f32 %v135_v44, %v134_v51 }
 0x119   :  { %v139_v52 = vadd.f32 %v138_v48, %v136_v50  ;;  %v2235_v50 = vld [vmem:[#allocation2] sm:$0xff] }
 0x11a   :  { %v140_v54 = vadd.f32 %v138_v48, %v137_v53 }
 0x11b   :  { %1848 = vmatmul.msk.f32.vlgmr.msra.gmra.mxu0 %vm83_vm0, %v139_v52 }
 0x123   :  { %1849 = vmatmul.msk.f32.gmra.mxu0 %vm83_vm0, %v140_v54 }
 0x198   :  { %v169_v3 = vpop.f32.mrf.mxu0 }
 0x199   :  { %v170_v4 = vadd.f32 %v169_v3, %v145_v62 }
 0x19b   :  { %v1850_v5 = vmul.f32 -1.442695, %v170_v4 }
 0x19d   :  { %1931 = vpow2.f32 %v1850_v5 }
 0x1a0   :  { %v172_v6 = vpop.f32.mrf.mxu0 }
 0x1a1   :  { %v173_v7 = vadd.f32 %v172_v6, %v145_v62 }
 0x1a3   :  { %v1932_v8 = vpop.eup %1931  ;;  %v1851_v9 = vmul.f32 -1.442695, %v173_v7 }
 0x1a4   :  { %v181_v11 = vadd.f32 1.0, %v1932_v8 }
 0x1a5   :  { %1933 = vpow2.f32 %v1851_v9 }
 0x1a6   :  { %1935 = vrcp.f32 %v181_v11  ;;  %v194_v17 = vand.u32 2147483648, %v181_v11  ;;  %v192_v19 = vand.u32 2147483647, %v181_v11  ;;  %vm188_vm9 = vweird.f32 %v181_v11 }
 0x1a8   :  { %v195_v22 = vor.u32 1.1754944e-38, %v194_v17  ;;  %vm193_vm11 = vcmp.eq.f32.partialorder %v192_v19, 8.507059e+37 }
 0x1ab   :  { %v1934_v12 = vpop.eup %1933 }
 0x1ac   :  { %v1936_v13 = vpop.eup %1935  ;;  %v182_v14 = vadd.f32 1.0, %v1934_v12 }
 0x1ad   :  { %v184_v15 = vmul.f32 %v1936_v13, %v181_v11  ;;  %vm189_vm8 = vweird.f32 %v1936_v13  ;;  %v305_v11 = vperm.slane %v2211_v43, 2 }
 0x1ae   :  { %1937 = vrcp.f32 %v182_v14  ;;  %vm190_vm10 = vmor %vm188_vm9, %vm189_vm8  ;;  %vm203_vm13 = vweird.f32 %v182_v14  ;;  %v209_v26 = vand.u32 2147483648, %v182_v14  ;;  %v207_v29 = vand.u32 2147483647, %v182_v14 }
 0x1af   :  { %v185_v16 = vsub.f32 1.0, %v184_v15  ;;  %vm350_vm8 = vcmask 64512   ;;  %vm365_vm9 = vcmask 130048  }
 0x1b0   :  { %v210_v31 = vor.u32 1.1754944e-38, %v209_v26  ;;  %vm208_vm1 = vcmp.eq.f32.partialorder %v207_v29, 8.507059e+37 }
 0x1b1   :  { %v186_v18 = vmul.f32 %v1936_v13, %v185_v16 }
 0x1b3   :  { %v187_v20 = vadd.f32 %v1936_v13, %v186_v18 }
 0x1b4   :  { %v1938_v21 = vpop.eup %1937 }
 0x1b5   :  { %v191_v23 = vsel %vm190_vm10, %v1936_v13, %v187_v20  ;;  %v199_v24 = vmul.f32 %v1938_v21, %v182_v14  ;;  %vm204_vm14 = vweird.f32 %v1938_v21 }
 0x1b6   :  { %v196_v25 = vsel %vm193_vm11, %v195_v22, %v191_v23  ;;  %vm205_vm15 = vmor %vm203_vm13, %vm204_vm14 }
 0x1b7   :  { %v213_v27 = vmul.f32 %v196_v25, %v170_v4  ;;  %v200_v28 = vsub.f32 1.0, %v199_v24 }
 0x1b9   :  { %1852 = vmatmul.msk.f32.vlgmr.msra.gmra.mxu1 %vm223_vm12, %v213_v27  ;;  %v201_v30 = vmul.f32 %v1938_v21, %v200_v28  ;;  %v312_v27 = vperm.slane %v2216_v60, 3 }
 0x1bb   :  { %v202_v32 = vadd.f32 %v1938_v21, %v201_v30 }
 0x1bd   :  { %v206_v33 = vsel %vm205_vm15, %v1938_v21, %v202_v32 }
 0x1be   :  { %v211_v34 = vsel %vm208_vm1, %v210_v31, %v206_v33 }
 0x1bf   :  { %v214_v35 = vmul.f32 %v211_v34, %v173_v7  ;;  %v302_v7 = vperm.slane %v2211_v43, 1 }
 0x1c1   :  { %1853 = vmatmul.msk.f32.gmra.mxu1 %vm223_vm12, %v214_v35 }
 0x236   :  { %v247_v37 = vpop.f32.mrf.mxu1 }
 0x237   :  { %v253_v38 = vadd.f32 %v247_v37, %v2190_v0 }
 0x239   :  { %v2223_v39 = vadd.f32 %v255_v36, %v253_v38  ;;  %v2134_v38 = vmov 0  }
 0x23a   :  { %1923 = vset.pattern.permute.xlu0 %v2134_v38  ;;  %1924 = vset.pattern.permute.xlu2 %v2134_v38 }
 0x23b   :  { %v258_v40 = vsel %vm83_vm0, %v2223_v39, 0.0 }
 0x23c   :  { %259 = vadd.xlane.f32.xlu2 %v258_v40  ;;  %v71_v40 = vld [vmem:[%s2792_s1] sm:$0x1] }
 0x23d   :  { %vm73_vm10 = vcmp.gt.f32.partialorder %v71_v40, 0.0 }
 0x23e   :  { %v250_v41 = vpop.f32.mrf.mxu1 }
 0x23f   :  { %v254_v42 = vadd.f32 %v250_v41, %v2195_v1  ;;  %v418_v41 = vsel %vm73_vm10, 1, %v2134_v38 }
 0x241   :  { %v2228_v44 = vadd.f32 %v255_v36, %v254_v42  ;;  %v420_v42 = vperm.slane %v418_v41, 0 }
 0x243   :  { %v261_v45 = vsel %vm83_vm0, %v2228_v44, 0.0  ;;  %vm2293_vm11 = vcmp.eq.s32.totalorder %v420_v42, 1 }
 0x244   :  { %262 = vadd.xlane.f32.xlu0 %v261_v45 }
 0x2af   :  { %v260_v46 = vpop.xlane.xlu2 %259 }
 0x2b0   :  { %v264_v47 = vmul.f32 %v260_v46, %v2201_v10 }
 0x2b2   :  { %v266_v0 = vsub.f32 %v2223_v39, %v264_v47 }
 0x2b4   :  { %v268_v48 = vmul.f32 %v266_v0, %v266_v0 }
 0x2b6   :  { %v270_v49 = vsel %vm83_vm0, %v268_v48, 0.0 }
 0x2b7   :  { %271 = vadd.xlane.f32.xlu2 %v270_v49  ;;  %v263_v1 = vpop.xlane.xlu0 %262 }
 0x2b8   :  { %v265_v51 = vmul.f32 %v263_v1, %v2201_v10 }
 0x2ba   :  { %v267_v52 = vsub.f32 %v2228_v44, %v265_v51 }
 0x2bc   :  { %v269_v53 = vmul.f32 %v267_v52, %v267_v52 }
 0x2be   :  { %v273_v54 = vsel %vm83_vm0, %v269_v53, 0.0 }
 0x2cf   :  { %360 = vrot.lane.b32.xlu2 %v2235_v50, %s2119_s30 }
 0x2f8   :  { %274 = vadd.xlane.f32.xlu2 %v273_v54 }
 0x32a   :  { %v272_v59 = vpop.xlane.xlu2 %271 }
 0x32b   :  { %v276_v61 = vmul.f32 %v272_v59, %v2201_v10 }
 0x32d   :  { %v278_v62 = vadd.f32 1e-12, %v276_v61 }
 0x32f   :  { %1939 = vrsqrt.f32 %v278_v62  ;;  %vm286_vm3 = vweird.f32 %v278_v62 }
 0x332   :  { %v361_v14 = vpop.permute.xlu2 %360 }
 0x335   :  { %v1940_v63 = vpop.eup %1939 }
 0x336   :  { %v281_v2 = vmul.f32 %v1940_v63, %v278_v62  ;;  %vm287_vm2 = vweird.f32 %v1940_v63 }
 0x337   :  { %vm288_vm4 = vmor %vm286_vm3, %vm287_vm2 }
 0x338   :  { %v282_v3 = vmul.f32 %v1940_v63, %v281_v2 }
 0x33a   :  { %v283_v4 = vmul.f32 0.5, %v282_v3 }
 0x33c   :  { %v284_v5 = vsub.f32 1.5, %v283_v4 }
 0x33e   :  { %v285_v6 = vmul.f32 %v1940_v63, %v284_v5 }
 0x340   :  { %v289_v8 = vsel %vm288_vm4, %v1940_v63, %v285_v6 }
 0x341   :  { %v300_v9 = vmul.f32 %v289_v8, %v266_v0 }
 0x343   :  { %v303_v12 = vmul.f32 %v302_v7, %v300_v9 }
 0x345   :  { %v306_v13 = vadd.f32 %v305_v11, %v303_v12 }
 0x347   :  { %1854 = vmatmul.msk.f32.vlgmr.msra.gmra.mxu2 %vm83_vm0, %v306_v13 }
 0x36b   :  { %v275_v15 = vpop.xlane.xlu2 %274 }
 0x36c   :  { %v277_v16 = vmul.f32 %v275_v15, %v2201_v10 }
 0x36e   :  { %v279_v17 = vadd.f32 1e-12, %v277_v16 }
 0x370   :  { %1941 = vrsqrt.f32 %v279_v17  ;;  %vm296_vm6 = vweird.f32 %v279_v17 }
 0x376   :  { %v1942_v18 = vpop.eup %1941 }
 0x377   :  { %v291_v19 = vmul.f32 %v1942_v18, %v279_v17  ;;  %vm297_vm5 = vweird.f32 %v1942_v18 }
 0x378   :  { %vm298_vm7 = vmor %vm296_vm6, %vm297_vm5 }
 0x379   :  { %v292_v20 = vmul.f32 %v1942_v18, %v291_v19 }
 0x37b   :  { %v293_v21 = vmul.f32 0.5, %v292_v20 }
 0x37d   :  { %v294_v22 = vsub.f32 1.5, %v293_v21 }
 0x37f   :  { %v295_v23 = vmul.f32 %v1942_v18, %v294_v22  ;;  %v72_v22 = vld [vmem:[%s2792_s1 + $0x1] sm:$0x1]  ;;  %s2136_s1 = smov 24  }
 0x380   :  { %vm74_vm2 = vcmp.gt.f32.partialorder %v72_v22, 0.0 }
 0x381   :  { %v299_v43 = vsel %vm298_vm7, %v1942_v18, %v295_v23 }
 0x382   :  { %v301_v24 = vmul.f32 %v299_v43, %v267_v52 }
 0x384   :  { %v304_v25 = vmul.f32 %v302_v7, %v301_v24 }
 0x386   :  { %v307_v26 = vadd.f32 %v305_v11, %v304_v25 }
 0x388   :  { %1855 = vmatmul.msk.f32.gmra.mxu2 %vm83_vm0, %v307_v26 }
 0x3ca   :  { %v336_v28 = vpop.f32.mrf.mxu2 }
 0x3cb   :  { %v2249_v29 = vadd.f32 %v336_v28, %v312_v27 }
 0x3cd   :  { %353 = vrot.lane.b32.xlu1 %v2249_v29, %s2123_s13  ;;  %344 = vrot.lane.b32.xlu0 %v2249_v29, %s2125_s0 }
 0x3d5   :  { %476 = vrot.lane.b32.xlu0 %v2249_v29, %s2126_s17 }
 0x3dd   :  { %528 = vrot.lane.b32.xlu0 %v2249_v29, %s2127_s18 }
 0x3e5   :  { %720 = vrot.lane.b32.xlu0 %v2249_v29, %s2128_s19 }
 0x40b   :  { %v339_v60 = vpop.f32.mrf.mxu2 }
 0x40c   :  { %v2260_v30 = vadd.f32 %v339_v60, %v312_v27  ;;  %v419_v27 = vsel %vm74_vm2, 1, %v2134_v38 }
 0x40d   :  { %v421_v60 = vperm.slane %v419_v27, 0 }
 0x40e   :  { %536 = vrot.lane.b32.xlu0 %v2260_v30, %s2129_s20  ;;  %355 = vrot.lane.b32.xlu2 %v2260_v30, %s2123_s13 }
 0x40f   :  { %vm2345_vm3 = vcmp.eq.s32.totalorder %v421_v60, 1 }
 0x416   :  { %722 = vrot.lane.b32.xlu0 %v2260_v30, %s2128_s19  ;;  %542 = vrot.lane.b32.xlu2 %v2249_v29, %s2130_s21 }
 0x41e   :  { %544 = vrot.lane.b32.xlu2 %v2260_v30, %s2130_s21 }
 0x426   :  { %530 = vrot.lane.b32.xlu2 %v2260_v30, %s2127_s18 }
 0x42e   :  { %712 = vrot.lane.b32.xlu2 %v2249_v29, %s2131_s22 }
 0x436   :  { %901 = vrot.lane.b32.xlu2 %v2235_v50, %s2132_s23 }
 0x43e   :  { %887 = vrot.lane.b32.xlu2 %v2249_v29, %s2133_s24 }
 0x43f   :  { %v354_v31 = vpop.permute.xlu1 %353  ;;  %v2277_v32 = vpop.permute.xlu0 %344 }
 0x440   :  { %v363_v33 = vsel %vm350_vm8, %v354_v31, %v361_v14  ;;  %v351_v34 = vsel %vm350_vm8, %v2249_v29, %v2277_v32 }
 0x441   :  { %1856 = vmatpush.xpose.msk.msra.mxu3 %vm365_vm9, %v363_v33 }
 0x444   :  { %1857 = vmatmul.msk.f32.vlgmr.msra.gmra.mxu3 %vm365_vm9, %v351_v34 }
 0x447   :  { %v477_v37 = vpop.permute.xlu0 %476 }
 0x44f   :  { %v529_v59 = vpop.permute.xlu0 %528 }
 0x457   :  { %v721_v63 = vpop.permute.xlu0 %720 }
 0x468   :  { %v356_v35 = vpop.permute.xlu2 %355 }
 0x469   :  { %v364_v36 = vsel %vm350_vm8, %v356_v35, %v361_v14 }
 0x46a   :  { %1858 = vmatpush.xpose.msk.msrb.mxu3 %vm365_vm9, %v364_v36 }
 0x46e   :  { %497 = vmatpush.msra.mxu3 %v477_v37 }
 0x470   :  { %v543_v51 = vpop.permute.xlu2 %542 }
 0x471   :  { %v548_v57 = vsel %vm350_vm8, %v543_v51, %v2235_v50 }
 0x478   :  { %v545_v54 = vpop.permute.xlu2 %544 }
 0x479   :  { %v549_v28 = vsel %vm350_vm8, %v545_v54, %v2235_v50 }
 0x480   :  { %v531_v58 = vpop.permute.xlu2 %530  ;;  %v537_v12 = vpop.permute.xlu0 %536 }
 0x481   :  { %v541_v38 = vsel %vm350_vm8, %v531_v58, %v537_v12 }
 0x488   :  { %v713_v62 = vpop.permute.xlu2 %712  ;;  %v723_v13 = vpop.permute.xlu0 %722 }
 0x490   :  { %v902_v4 = vpop.permute.xlu2 %901 }
 0x498   :  { %v888_v8 = vpop.permute.xlu2 %887 }
 0x499   :  { %v893_v11 = vsel %vm350_vm8, %v2277_v32, %v888_v8 }
 0x4c7   :  { %v389_v46 = vpop.f32.mrf.mxu3 }
 0x4c8   :  { %v424_v47 = vsel %vm2293_vm11, %v389_v46, -1e+30 }
 0x4c9   :  { %v426_v0 = vsel %vm350_vm8, %v424_v47, -inf }
 0x4ca   :  { %427 = vmax.xlane.f32.xlu1 %v426_v0 }
 0x4e3   :  { %346 = vrot.lane.b32.xlu1 %v2260_v30, %s2125_s0 }
 0x4eb   :  { %534 = vrot.lane.b32.xlu1 %v2249_v29, %s2129_s20 }
 0x4f3   :  { %726 = vrot.lane.b32.xlu1 %v2235_v50, %s2127_s18 }
 0x4fb   :  { %706 = vrot.lane.b32.xlu1 %v2249_v29, %s2132_s23 }
 0x503   :  { %895 = vrot.lane.b32.xlu1 %v2249_v29, %s2135_s27 }
 0x50b   :  { %714 = vrot.lane.b32.xlu1 %v2260_v30, %s2131_s22 }
 0x513   :  { %889 = vrot.lane.b32.xlu1 %v2260_v30, %s2133_s24 }
 0x53d   :  { %v428_v48 = vpop.xlane.xlu1 %427 }
 0x53e   :  { %v432_v49 = vsub.f32 %v424_v47, %v428_v48 }
 0x540   :  { %v434_v1 = vmul.f32 1.442695, %v432_v49 }
 0x542   :  { %1943 = vpow2.f32 %v434_v1 }
 0x548   :  { %v1944_v52 = vpop.eup %1943 }
 0x549   :  { %v438_v53 = vsel %vm350_vm8, %v1944_v52, 0.0 }
 0x54a   :  { %439 = vadd.xlane.f32.xlu0 %v438_v53 }
 0x555   :  { %v2314_v55 = vpop.permute.xlu1 %346 }
 0x556   :  { %v352_v56 = vsel %vm350_vm8, %v2260_v30, %v2314_v55 }
 0x557   :  { %1859 = vmatmul.msk.f32.vlgmr.msrb.gmra.mxu3 %vm365_vm9, %v352_v56 }
 0x558   :  { %1862 = vmatpush.xpose.msk.msrb.mxu3 %vm365_vm9, %v548_v57 }
 0x55d   :  { %v535_v61 = vpop.permute.xlu1 %534 }
 0x55e   :  { %708 = vrot.lane.b32.xlu0 %v2260_v30, %s2132_s23  ;;  %v540_v33 = vsel %vm350_vm8, %v529_v59, %v535_v61 }
 0x565   :  { %v727_v2 = vpop.permute.xlu1 %726 }
 0x566   :  { %897 = vrot.lane.b32.xlu0 %v2260_v30, %s2135_s27  ;;  %v729_v3 = vsel %vm350_vm8, %v721_v63, %v727_v2  ;;  %v730_v34 = vsel %vm350_vm8, %v723_v13, %v727_v2 }
 0x567   :  { %1868 = vmatpush.xpose.msk.msrb.mxu2 %vm365_vm9, %v729_v3 }
 0x56d   :  { %v707_v5 = vpop.permute.xlu1 %706 }
 0x56e   :  { %v718_v6 = vsel %vm350_vm8, %v707_v5, %v713_v62 }
 0x56f   :  { %1869 = vmatmul.msk.f32.vlgmr.msrb.gmra.mxu2 %vm365_vm9, %v718_v6 }
 0x575   :  { %v896_v7 = vpop.permute.xlu1 %895 }
 0x576   :  { %v904_v9 = vsel %vm350_vm8, %v896_v7, %v902_v4 }
 0x577   :  { %1874 = vmatpush.xpose.msk.msra.mxu2 %vm365_vm9, %v904_v9 }
 0x57a   :  { %1875 = vmatmul.msk.f32.vlgmr.msra.gmra.mxu2 %vm365_vm9, %v893_v11 }
 0x57d   :  { %v715_v41 = vpop.permute.xlu1 %714 }
 0x585   :  { %v890_v46 = vpop.permute.xlu1 %889 }
 0x586   :  { %v894_v47 = vsel %vm350_vm8, %v2314_v55, %v890_v46 }
 0x5bd   :  { %v440_v14 = vpop.xlane.xlu0 %439 }
 0x5be   :  { %1945 = vrcp.f32 %v440_v14  ;;  %v455_v18 = vand.u32 2147483648, %v440_v14  ;;  %v453_v20 = vand.u32 2147483647, %v440_v14  ;;  %vm449_vm14 = vweird.f32 %v440_v14 }
 0x5c0   :  { %v456_v23 = vor.u32 1.1754944e-38, %v455_v18  ;;  %vm454_vm1 = vcmp.eq.f32.partialorder %v453_v20, 8.507059e+37 }
 0x5c4   :  { %v1946_v15 = vpop.eup %1945 }
 0x5c5   :  { %v445_v16 = vmul.f32 %v1946_v15, %v440_v14  ;;  %vm450_vm13 = vweird.f32 %v1946_v15 }
 0x5c6   :  { %vm451_vm15 = vmor %vm449_vm14, %vm450_vm13 }
 0x5c7   :  { %v446_v17 = vsub.f32 1.0, %v445_v16 }
 0x5c9   :  { %v447_v19 = vmul.f32 %v1946_v15, %v446_v17 }
 0x5cb   :  { %v448_v21 = vadd.f32 %v1946_v15, %v447_v19 }
 0x5cd   :  { %v452_v43 = vsel %vm451_vm15, %v1946_v15, %v448_v21  ;;  %v1918_v21 = vpack.i.bf16 %v2260_v30, %v2249_v29 }
 0x5ce   :  { %v457_v24 = vsel %vm454_vm1, %v456_v23, %v452_v43 }
 0x5cf   :  { %v458_v25 = vmul.f32 %v1944_v52, %v457_v24 }
 0x5d0   :  { %v709_v31 = vpop.permute.xlu0 %708 }
 0x5d1   :  { %v474_v26 = vsel %vm2293_vm11, %v458_v25, 0.0  ;;  %v719_v42 = vsel %vm350_vm8, %v709_v31, %v715_v41 }
 0x5d2   :  { %1860 = vmatmul.msk.f32.vlgmr.msra.gmra.mxu3 %vm350_vm8, %v474_v26 }
 0x5d3   :  { %1864 = vmatpush.xpose.msk.msra.mxu3 %vm365_vm9, %v549_v28 }
 0x5d8   :  { %v898_v37 = vpop.permute.xlu0 %897 }
 0x5d9   :  { %v905_v40 = vsel %vm350_vm8, %v898_v37, %v902_v4 }
 0x5da   :  { %v415_v35 = vpop.f32.mrf.mxu3  ;;  %1863 = vmatmul.msk.f32.vlgmr.msrb.gmra.mxu3 %vm365_vm9, %v540_v33 }
 0x5db   :  { %v425_v50 = vsel %vm2345_vm3, %v415_v35, -1e+30  ;;  %1870 = vmatpush.xpose.msk.msrb.mxu3 %vm365_vm9, %v730_v34 }
 0x5dc   :  { %v429_v36 = vsel %vm350_vm8, %v425_v50, -inf }
 0x5dd   :  { %430 = vmax.xlane.f32.xlu2 %v429_v36 }
 0x5e2   :  { %1865 = vmatmul.msk.f32.vlgmr.msra.gmra.mxu3 %vm365_vm9, %v541_v38 }
 0x5e3   :  { %1876 = vmatpush.xpose.msk.msra.mxu3 %vm365_vm9, %v905_v40 }
 0x5ea   :  { %1871 = vmatmul.msk.f32.vlgmr.msrb.gmra.mxu3 %vm365_vm9, %v719_v42 }
 0x5f2   :  { %v754_v0 = vpop.f32.mrf.mxu2  ;;  %1877 = vmatmul.msk.f32.vlgmr.msra.gmra.mxu3 %vm365_vm9, %v894_v47 }
 0x5f3   :  { %v783_v48 = vsel %vm2293_vm11, %v754_v0, -1e+30 }
 0x5f4   :  { %v785_v49 = vsel %vm350_vm8, %v783_v48, -inf }
 0x5f5   :  { %786 = vmax.xlane.f32.xlu2 %v785_v49 }
 0x5fd   :  { %v929_v1 = vpop.f32.mrf.mxu2 }
 0x5fe   :  { %v958_v51 = vsel %vm2293_vm11, %v929_v1, -1e+30 }
 0x5ff   :  { %v960_v52 = vsel %vm350_vm8, %v958_v51, -inf }
 0x600   :  { %961 = vmax.xlane.f32.xlu1 %v960_v52 }
 0x650   :  { %v431_v53 = vpop.xlane.xlu2 %430 }
 0x651   :  { %v433_v55 = vsub.f32 %v425_v50, %v431_v53 }
 0x653   :  { %v436_v56 = vmul.f32 1.442695, %v433_v55 }
 0x655   :  { %v2371_v54 = vpop.f32.mrf.mxu3  ;;  %1947 = vpow2.f32 %v436_v56 }
 0x65b   :  { %v2376_v61 = vpop.eup %1947 }
 0x65c   :  { %v441_v2 = vsel %vm350_vm8, %v2376_v61, 0.0 }
 0x65d   :  { %v573_v57 = vpop.f32.mrf.mxu3 }
 0x65e   :  { %v602_v58 = vsel %vm2293_vm11, %v573_v57, -1e+30 }
 0x65f   :  { %v604_v59 = vsel %vm350_vm8, %v602_v58, -inf }
 0x660   :  { %605 = vmax.xlane.f32.xlu0 %v604_v59 }
 0x665   :  { %v599_v62 = vpop.f32.mrf.mxu3 }
 0x666   :  { %v603_v63 = vsel %vm2345_vm3, %v599_v62, -1e+30 }
 0x667   :  { %v607_v3 = vsel %vm350_vm8, %v603_v63, -inf }
 0x668   :  { %v787_v4 = vpop.xlane.xlu2 %786  ;;  %442 = vadd.xlane.f32.xlu0 %v441_v2  ;;  %608 = vmax.xlane.f32.xlu1 %v607_v3 }
 0x669   :  { %v791_v5 = vsub.f32 %v783_v48, %v787_v4 }
 0x66b   :  { %v793_v6 = vmul.f32 1.442695, %v791_v5 }
 0x66d   :  { %v780_v7 = vpop.f32.mrf.mxu3  ;;  %1949 = vpow2.f32 %v793_v6 }
 0x66e   :  { %v784_v8 = vsel %vm2345_vm3, %v780_v7, -1e+30 }
 0x66f   :  { %v788_v9 = vsel %vm350_vm8, %v784_v8, -inf }
 0x670   :  { %789 = vmax.xlane.f32.xlu0 %v788_v9 }
 0x673   :  { %v962_v11 = vpop.xlane.xlu1 %961  ;;  %v2386_v12 = vpop.eup %1949 }
 0x674   :  { %v966_v13 = vsub.f32 %v958_v51, %v962_v11  ;;  %v797_v17 = vsel %vm350_vm8, %v2386_v12, 0.0 }
 0x675   :  { %v955_v14 = vpop.f32.mrf.mxu3 }
 0x676   :  { %v968_v15 = vmul.f32 1.442695, %v966_v13  ;;  %v959_v16 = vsel %vm2345_vm3, %v955_v14, -1e+30 }
 0x677   :  { %v963_v18 = vsel %vm350_vm8, %v959_v16, -inf }
 0x678   :  { %1951 = vpow2.f32 %v968_v15  ;;  %798 = vadd.xlane.f32.xlu0 %v797_v17  ;;  %964 = vmax.xlane.f32.xlu2 %v963_v18 }
 0x67e   :  { %v2393_v19 = vpop.eup %1951 }
 0x67f   :  { %v972_v20 = vsel %vm350_vm8, %v2393_v19, 0.0 }
 0x680   :  { %973 = vadd.xlane.f32.xlu0 %v972_v20 }
 0x681   :  { %502 = vrot.lane.b32.xlu1 %v2260_v30, %s2126_s17 }
 0x690   :  { %1919 = vrot.lane.b32.xlu2 %v1918_v21, %s2136_s1 }
 0x6d3   :  { %v606_v22 = vpop.xlane.xlu0 %605 }
 0x6d4   :  { %v610_v23 = vsub.f32 %v602_v58, %v606_v22 }
 0x6d6   :  { %v612_v43 = vmul.f32 1.442695, %v610_v23 }
 0x6d8   :  { %1953 = vpow2.f32 %v612_v43 }
 0x6db   :  { %v609_v24 = vpop.xlane.xlu1 %608  ;;  %v443_v25 = vpop.xlane.xlu0 %442 }
 0x6dc   :  { %v611_v26 = vsub.f32 %v603_v63, %v609_v24  ;;  %1955 = vrcp.f32 %v443_v25  ;;  %v470_v40 = vand.u32 2147483648, %v443_v25  ;;  %v468_v42 = vand.u32 2147483647, %v443_v25 }
 0x6dd   :  { %vm464_vm5 = vweird.f32 %v443_v25 }
 0x6de   :  { %v2402_v27 = vpop.eup %1953  ;;  %v614_v28 = vmul.f32 1.442695, %v611_v26  ;;  %v471_v47 = vor.u32 1.1754944e-38, %v470_v40  ;;  %vm469_vm7 = vcmp.eq.f32.partialorder %v468_v42, 8.507059e+37 }
 0x6df   :  { %v616_v60 = vsel %vm350_vm8, %v2402_v27, 0.0 }
 0x6e0   :  { %1957 = vpow2.f32 %v614_v28  ;;  %617 = vadd.xlane.f32.xlu1 %v616_v60 }
 0x6e2   :  { %v1956_v31 = vpop.eup %1955 }
 0x6e3   :  { %v460_v33 = vmul.f32 %v1956_v31, %v443_v25  ;;  %v790_v34 = vpop.xlane.xlu0 %789  ;;  %vm465_vm4 = vweird.f32 %v1956_v31 }
 0x6e4   :  { %v792_v35 = vsub.f32 %v784_v8, %v790_v34  ;;  %vm466_vm6 = vmor %vm464_vm5, %vm465_vm4 }
 0x6e5   :  { %v461_v50 = vsub.f32 1.0, %v460_v33 }
 0x6e6   :  { %v2406_v36 = vpop.eup %1957  ;;  %v795_v37 = vmul.f32 1.442695, %v792_v35 }
 0x6e7   :  { %v462_v38 = vmul.f32 %v1956_v31, %v461_v50  ;;  %v619_v41 = vsel %vm350_vm8, %v2406_v36, 0.0 }
 0x6e8   :  { %1959 = vpow2.f32 %v795_v37  ;;  %620 = vadd.xlane.f32.xlu2 %v619_v41 }
 0x6e9   :  { %v463_v46 = vadd.f32 %v1956_v31, %v462_v38 }
 0x6eb   :  { %v965_v0 = vpop.xlane.xlu2 %964  ;;  %v467_v48 = vsel %vm466_vm6, %v1956_v31, %v463_v46  ;;  %v2430_v3 = vpop.xlane.xlu0 %798 }
 0x6ec   :  { %v967_v49 = vsub.f32 %v959_v16, %v965_v0  ;;  %v472_v1 = vsel %vm469_vm7, %v471_v47, %v467_v48 }
 0x6ed   :  { %v473_v55 = vmul.f32 %v2376_v61, %v472_v1 }
 0x6ee   :  { %v2410_v51 = vpop.eup %1959  ;;  %v970_v52 = vmul.f32 1.442695, %v967_v49 }
 0x6ef   :  { %v800_v53 = vsel %vm350_vm8, %v2410_v51, 0.0  ;;  %v475_v59 = vsel %vm2345_vm3, %v473_v55, 0.0 }
 0x6f0   :  { %1961 = vpow2.f32 %v970_v52  ;;  %801 = vadd.xlane.f32.xlu2 %v800_v53 }
 0x6f3   :  { %v503_v56 = vpop.permute.xlu1 %502  ;;  %v1920_v57 = vpop.permute.xlu2 %1919 }
 0x6f4   :  { %v1921_v58 = vunpack.i.l.bf16 %v1920_v57  ;;  %523 = vmatpush.msrb.mxu0 %v503_v56  ;;  %v1922_v62 = vunpack.i.h.bf16 %v1920_v57  ;;  %v2433_v11 = vpop.xlane.xlu0 %973  ;;  %v814_v56 = vand.u32 2147483648, %v2430_v3 }
 0x6f5   :  { %1861 = vmatmul.msk.f32.vlgmr.msrb.gmra.mxu0 %vm350_vm8, %v475_v59 }
 0x6f6   :  { %v2418_v63 = vpop.eup %1961  ;;  %675 = vmatpush.msra.mxu0 %v1921_v58  ;;  %701 = vmatpush.msrb.mxu1 %v1922_v62  ;;  %v812_v58 = vand.u32 2147483647, %v2430_v3 }
 0x6f7   :  { %v975_v2 = vsel %vm350_vm8, %v2418_v63, 0.0 }
 0x6f8   :  { %976 = vadd.xlane.f32.xlu0 %v975_v2 }
 0x6f9   :  { %861 = vrot.lane.b32.xlu1 %v2260_v30, %s2137_s8 }
 0x701   :  { %1010 = vrot.lane.b32.xlu1 %v2249_v29, %s2119_s30 }
 0x708   :  { %1036 = vrot.lane.b32.xlu2 %v2260_v30, %s2119_s30 }
 0x70c   :  { %835 = vrot.lane.b32.xlu0 %v2249_v29, %s2137_s8 }
 0x753   :  { %v618_v61 = vpop.xlane.xlu1 %617 }
 0x754   :  { %1963 = vrcp.f32 %v618_v61  ;;  %v633_v9 = vand.u32 2147483648, %v618_v61  ;;  %v631_v30 = vand.u32 2147483647, %v618_v61  ;;  %vm627_vm13 = vweird.f32 %v618_v61 }
 0x755   :  { %1965 = vrcp.f32 %v2430_v3 }
 0x756   :  { %v634_v15 = vor.u32 1.1754944e-38, %v633_v9  ;;  %vm632_vm15 = vcmp.eq.f32.partialorder %v631_v30, 8.507059e+37 }
 0x75a   :  { %v1964_v4 = vpop.eup %1963 }
 0x75b   :  { %v623_v5 = vmul.f32 %v1964_v4, %v618_v61  ;;  %v621_v6 = vpop.xlane.xlu2 %620  ;;  %vm628_vm10 = vweird.f32 %v1964_v4  ;;  %v2435_v13 = vpop.eup %1965 }
 0x75c   :  { %1967 = vrcp.f32 %v621_v6  ;;  %vm629_vm14 = vmor %vm627_vm13, %vm628_vm10  ;;  %v804_v20 = vmul.f32 %v2435_v13, %v2430_v3  ;;  %v648_v23 = vand.u32 2147483648, %v621_v6  ;;  %v646_v25 = vand.u32 2147483647, %v621_v6 }
 0x75d   :  { %v624_v7 = vsub.f32 1.0, %v623_v5  ;;  %1969 = vrcp.f32 %v2433_v11  ;;  %vm642_vm2 = vweird.f32 %v621_v6  ;;  %vm809_vm7 = vweird.f32 %v2435_v13 }
 0x75e   :  { %v805_v60 = vsub.f32 1.0, %v804_v20  ;;  %v649_v34 = vor.u32 1.1754944e-38, %v648_v23  ;;  %vm647_vm5 = vcmp.eq.f32.partialorder %v646_v25, 8.507059e+37 }
 0x75f   :  { %v625_v8 = vmul.f32 %v1964_v4, %v624_v7 }
 0x760   :  { %v806_v40 = vmul.f32 %v2435_v13, %v805_v60 }
 0x761   :  { %v626_v29 = vadd.f32 %v1964_v4, %v625_v8 }
 0x762   :  { %v1968_v14 = vpop.eup %1967  ;;  %v807_v1 = vadd.f32 %v2435_v13, %v806_v40 }
 0x763   :  { %v638_v16 = vmul.f32 %v1968_v14, %v621_v6  ;;  %v802_v17 = vpop.xlane.xlu2 %801  ;;  %v630_v18 = vsel %vm629_vm14, %v1964_v4, %v626_v29  ;;  %vm643_vm1 = vweird.f32 %v1968_v14  ;;  %v2443_v28 = vpop.eup %1969  ;;  %vm808_vm14 = vweird.f32 %v2430_v3 }
 0x764   :  { %1971 = vrcp.f32 %v802_v17  ;;  %v635_v22 = vsel %vm632_vm15, %v634_v15, %v630_v18  ;;  %vm644_vm4 = vmor %vm642_vm2, %vm643_vm1  ;;  %v979_v41 = vmul.f32 %v2443_v28, %v2433_v11  ;;  %v829_v46 = vand.u32 2147483648, %v802_v17 }
 0x765   :  { %v639_v21 = vsub.f32 1.0, %v638_v16  ;;  %v636_v43 = vmul.f32 %v2402_v27, %v635_v22  ;;  %v827_v48 = vand.u32 2147483647, %v802_v17  ;;  %vm823_vm10 = vweird.f32 %v802_v17  ;;  %vm810_vm1 = vmor %vm808_vm14, %vm809_vm7 }
 0x766   :  { %v980_v52 = vsub.f32 1.0, %v979_v41  ;;  %v811_v5 = vsel %vm810_vm1, %v2435_v13, %v807_v1  ;;  %v815_v6 = vor.u32 1.1754944e-38, %v814_v56  ;;  %vm813_vm2 = vcmp.eq.f32.partialorder %v812_v58, 8.507059e+37 }
 0x767   :  { %v640_v24 = vmul.f32 %v1968_v14, %v639_v21  ;;  %v652_v26 = vsel %vm2293_vm11, %v636_v43, 0.0  ;;  %vm828_vm15 = vcmp.eq.f32.partialorder %v827_v48, 8.507059e+37  ;;  %vm983_vm7 = vweird.f32 %v2433_v11 }
 0x768   :  { %1866 = vmatmul.msk.f32.vlgmr.msra.gmra.mxu0 %vm350_vm8, %v652_v26  ;;  %v981_v61 = vmul.f32 %v2443_v28, %v980_v52  ;;  %v816_v29 = vsel %vm813_vm2, %v815_v6, %v811_v5  ;;  %v987_v15 = vand.u32 2147483647, %v2433_v11 }
 0x769   :  { %v641_v31 = vadd.f32 %v1968_v14, %v640_v24 }
 0x76a   :  { %v1972_v33 = vpop.eup %1971 }
 0x76b   :  { %v819_v35 = vmul.f32 %v1972_v33, %v802_v17  ;;  %v862_v50 = vpop.permute.xlu1 %861  ;;  %v645_v37 = vsel %vm644_vm4, %v1968_v14, %v641_v31  ;;  %v977_v27 = vpop.xlane.xlu0 %976  ;;  %vm824_vm6 = vweird.f32 %v1972_v33  ;;  %v982_v14 = vadd.f32 %v2443_v28, %v981_v61  ;;  %v75_v61 = vld [vmem:[%s2793_s2] sm:$0xff] }
 0x76c   :  { %882 = vmatpush.msra.mxu1 %v862_v50  ;;  %v650_v38 = vsel %vm647_vm5, %v649_v34, %v645_v37  ;;  %1973 = vrcp.f32 %v977_v27  ;;  %v1037_v55 = vpop.permute.xlu2 %1036  ;;  %vm825_vm13 = vmor %vm823_vm10, %vm824_vm6  ;;  %v1004_v8 = vand.u32 2147483648, %v977_v27  ;;  %v1002_v30 = vand.u32 2147483647, %v977_v27  ;;  %v1094_v50 = vld [vmem:[#allocation7 + $0x50] sm:$0xff] }
 0x76d   :  { %v820_v42 = vsub.f32 1.0, %v819_v35  ;;  %v651_v47 = vmul.f32 %v2406_v36, %v650_v38  ;;  %v830_v36 = vor.u32 1.1754944e-38, %v829_v46  ;;  %vm984_vm5 = vweird.f32 %v2443_v28  ;;  %v1095_v35 = vld [vmem:[#allocation7 + $0x90] sm:$0xff] }
 0x76e   :  { %vm998_vm6 = vweird.f32 %v977_v27  ;;  %v1005_v16 = vor.u32 1.1754944e-38, %v1004_v8  ;;  %v817_v17 = vmul.f32 %v2386_v12, %v816_v29  ;;  %vm1003_vm14 = vcmp.eq.f32.partialorder %v1002_v30, 8.507059e+37  ;;  %v1093_v37 = vld [vmem:[#allocation7 + $0x10] sm:$0xff]  ;;  %v76_v29 = vld [vmem:[%s2793_s2 + $0x8] sm:$0xff]  ;;  %s2138_s2 = smov [#allocation8]  }
 0x76f   :  { %v821_v0 = vmul.f32 %v1972_v33, %v820_v42  ;;  %v653_v49 = vsel %vm2345_vm3, %v651_v47, 0.0  ;;  %s1832_s12 = sshll.u32 %s2138_s2, 4  ;;  %s1833_s12 = int_to_ptr.vmem [resolvable:$true] %s1832_s12 }
 0x770   :  { %1867 = vmatmul.msk.f32.vlgmr.msrb.gmra.mxu1 %vm350_vm8, %v653_v49  ;;  %v833_v24 = vsel %vm2293_vm11, %v817_v17, 0.0 }
 0x771   :  { %v822_v53 = vadd.f32 %v1972_v33, %v821_v0  ;;  %1057 = vmatpush.msrb.mxu1 %v1037_v55 }
 0x772   :  { %v1974_v57 = vpop.eup %1973 }
 0x773   :  { %v826_v59 = vsel %vm825_vm13, %v1972_v33, %v822_v53  ;;  %v994_v62 = vmul.f32 %v1974_v57, %v977_v27  ;;  %vm999_vm4 = vweird.f32 %v1974_v57  ;;  %vm985_vm13 = vmor %vm983_vm7, %vm984_vm5  ;;  %v2497_v53 = vld [vmem:[#allocation5 + $0x18] sm:$0xff] }
 0x774   :  { %v831_v2 = vsel %vm828_vm15, %v830_v36, %v826_v59  ;;  %vm1000_vm10 = vmor %vm998_vm6, %vm999_vm4  ;;  %v986_v21 = vsel %vm985_vm13, %v2443_v28, %v982_v14  ;;  %vm988_vm15 = vcmp.eq.f32.partialorder %v987_v15, 8.507059e+37  ;;  %v525_v28 = vpop.f32.mrf.mxu0  ;;  %v1196_v14 = vld [vmem:[#allocation7 + $0xd8] sm:$0xff] }
 0x775   :  { %v832_v4 = vmul.f32 %v2410_v51, %v831_v2  ;;  %v995_v7 = vsub.f32 1.0, %v994_v62  ;;  %v989_v51 = vand.u32 2147483648, %v2433_v11  ;;  %v1011_v11 = vpop.permute.xlu1 %1010  ;;  %1216 = vmatpush.msrb.mxu3 %v1196_v14  ;;  %v1193_v15 = vld [vmem:[#allocation7 + $0x18] sm:$0xff] }
 0x777   :  { %v834_v3 = vsel %vm2345_vm3, %v832_v4, 0.0  ;;  %v996_v9 = vmul.f32 %v1974_v57, %v995_v7  ;;  %v990_v22 = vor.u32 1.1754944e-38, %v989_v51  ;;  %v1195_v51 = vld [vmem:[#allocation7 + $0x98] sm:$0xff] }
 0x778   :  { %1873 = vmatmul.msk.f32.vlgmr.msra.gmra.mxu1 %vm350_vm8, %v834_v3  ;;  %1217 = vmatpush.msrb.mxu3 %v1195_v51 }
 0x779   :  { %v997_v13 = vadd.f32 %v1974_v57, %v996_v9  ;;  %v991_v25 = vsel %vm988_vm15, %v990_v22, %v986_v21 }
 0x77a   :  { %v992_v26 = vmul.f32 %v2393_v19, %v991_v25  ;;  %v1096_v19 = vld [vmem:[#allocation7 + $0xd0] sm:$0xff] }
 0x77b   :  { %v1001_v18 = vsel %vm1000_vm10, %v1974_v57, %v997_v13  ;;  %1115 = vmatpush.msrb.mxu2 %v1096_v19  ;;  %v1194_v13 = vld [vmem:[#allocation7 + $0x58] sm:$0xff] }
 0x77c   :  { %v1006_v20 = vsel %vm1003_vm14, %v1005_v16, %v1001_v18  ;;  %1218 = vmatpush.msrb.mxu3 %v1194_v13 }
 0x77d   :  { %v1007_v43 = vmul.f32 %v2418_v63, %v1006_v20  ;;  %v1008_v63 = vsel %vm2293_vm11, %v992_v26, 0.0  ;;  %1116 = vmatpush.msrb.mxu2 %v1095_v35  ;;  %vm1090_vm11 = vcmask 195584  }
 0x77e   :  { %v836_v23 = vpop.permute.xlu0 %835  ;;  %1219 = vmatpush.msrb.mxu3 %v1193_v15 }
 0x77f   :  { %856 = vmatpush.msrb.mxu0 %v836_v23  ;;  %v1009_v12 = vsel %vm2345_vm3, %v1007_v43, 0.0  ;;  %1117 = vmatpush.msrb.mxu2 %v1094_v50 }
 0x780   :  { %1872 = vmatmul.msk.f32.vlgmr.msrb.gmra.mxu0 %vm350_vm8, %v833_v24  ;;  %1879 = vmatmul.msk.f32.vlgmr.msrb.gmra.mxu1 %vm350_vm8, %v1009_v12 }
 0x781   :  { %1031 = vmatpush.msra.mxu0 %v1011_v11  ;;  %1118 = vmatpush.msrb.mxu2 %v1093_v37 }
 0x788   :  { %1878 = vmatmul.msk.f32.vlgmr.msra.gmra.mxu0 %vm350_vm8, %v1008_v63 }
 0x7e5   :  { %v677_v60 = vpop.f32.mrf.mxu0 }
 0x7e6   :  { %1064 = vrot.lane.b32.xlu1 %v677_v60, %s2119_s30 }
 0x7ed   :  { %v703_v31 = vpop.f32.mrf.mxu1 }
 0x7ee   :  { %1066 = vrot.lane.b32.xlu1 %v703_v31, %s2119_s30 }
 0x7f5   :  { %v884_v33 = vpop.f32.mrf.mxu1 }
 0x7fd   :  { %v858_v32 = vpop.f32.mrf.mxu0  ;;  %v1059_v45 = vpop.f32.mrf.mxu1 }
 0x7fe   :  { %1072 = vrot.lane.b32.xlu0 %v858_v32, %s2137_s8 }
 0x805   :  { %v1033_v34 = vpop.f32.mrf.mxu0 }
 0x806   :  { %1074 = vrot.lane.b32.xlu0 %v884_v33, %s2137_s8  ;;  %1080 = vrot.lane.b32.xlu2 %v1033_v34, %s2136_s1 }
 0x80e   :  { %1082 = vrot.lane.b32.xlu2 %v1059_v45, %s2136_s1 }
 0x858   :  { %v1065_v27 = vpop.permute.xlu1 %1064 }
 0x859   :  { %v1086_v40 = vsel %vm350_vm8, %v2371_v54, %v1065_v27  ;;  %v1128_v54 = vperm.slane %v2497_v53, 4 }
 0x860   :  { %v1081_v38 = vpop.permute.xlu2 %1080  ;;  %v1067_v47 = vpop.permute.xlu1 %1066 }
 0x861   :  { %v1087_v0 = vsel %vm350_vm8, %v525_v28, %v1067_v47  ;;  %v2524_v28 = vld [vmem:[#allocation5 + $0x10] sm:$0xff] }
 0x862   :  { %v1175_v60 = vperm.slane %v2524_v28, 3  ;;  %v1178_v33 = vperm.slane %v2524_v28, 4 }
 0x868   :  { %v1083_v49 = vpop.permute.xlu2 %1082 }
 0x870   :  { %v1073_v41 = vpop.permute.xlu0 %1072 }
 0x871   :  { %v1088_v42 = vsel %vm365_vm9, %v1086_v40, %v1073_v41 }
 0x872   :  { %v1091_v46 = vsel %vm1090_vm11, %v1088_v42, %v1081_v38 }
 0x873   :  { %1880 = vmatmul.msk.f32.vlgmr.msrb.gmra.mxu2 %vm83_vm0, %v1091_v46 }
 0x878   :  { %v1075_v48 = vpop.permute.xlu0 %1074 }
 0x879   :  { %v1089_v1 = vsel %vm365_vm9, %v1087_v0, %v1075_v48  ;;  %v1197_v48 = vperm.slane %v2497_v53, 5 }
 0x87a   :  { %v1092_v52 = vsel %vm1090_vm11, %v1089_v1, %v1083_v49 }
 0x87b   :  { %1881 = vmatmul.msk.f32.gmra.mxu2 %vm83_vm0, %v1092_v52 }
 0x8f6   :  { %v1120_v55 = vpop.f32.mrf.mxu2 }
 0x8f7   :  { %v1126_v56 = vadd.f32 %v1120_v55, %v2223_v39 }
 0x8f9   :  { %v2501_v36 = vadd.f32 %v1128_v54, %v1126_v56 }
 0x8fb   :  { %v1131_v57 = vsel %vm83_vm0, %v2501_v36, 0.0 }
 0x8fc   :  { %1132 = vadd.xlane.f32.xlu1 %v1131_v57 }
 0x8fe   :  { %v1123_v58 = vpop.f32.mrf.mxu2 }
 0x8ff   :  { %v1127_v59 = vadd.f32 %v1123_v58, %v2228_v44 }
 0x901   :  { %v2506_v62 = vadd.f32 %v1128_v54, %v1127_v59 }
 0x903   :  { %v1134_v2 = vsel %vm83_vm0, %v2506_v62, 0.0 }
 0x904   :  { %1135 = vadd.xlane.f32.xlu0 %v1134_v2 }
 0x918   :  { %1183 = vperm.xlu0 %1923, %v75_v61  }
 0x96f   :  { %v1133_v39 = vpop.xlane.xlu1 %1132 }
 0x970   :  { %v1137_v4 = vmul.f32 %v1133_v39, %v2201_v10 }
 0x972   :  { %v1139_v5 = vsub.f32 %v2501_v36, %v1137_v4 }
 0x974   :  { %v1141_v6 = vmul.f32 %v1139_v5, %v1139_v5 }
 0x976   :  { %v1143_v7 = vsel %vm83_vm0, %v1141_v6, 0.0 }
 0x977   :  { %1144 = vadd.xlane.f32.xlu2 %v1143_v7  ;;  %v1136_v44 = vpop.xlane.xlu0 %1135 }
 0x978   :  { %v1138_v8 = vmul.f32 %v1136_v44, %v2201_v10 }
 0x97a   :  { %v1140_v3 = vsub.f32 %v2506_v62, %v1138_v8 }
 0x97c   :  { %v1142_v9 = vmul.f32 %v1140_v3, %v1140_v3 }
 0x97e   :  { %v1146_v30 = vsel %vm83_vm0, %v1142_v9, 0.0 }
 0x97f   :  { %1147 = vadd.xlane.f32.xlu1 %v1146_v30 }
 0x98a   :  { %v2528_v50 = vpop.permute.xlu0 %1183 }
 0x98f   :  { %1188 = vperm.xlu2 %1924, %v76_v29  }
 0x9ea   :  { %v1145_v16 = vpop.xlane.xlu2 %1144 }
 0x9eb   :  { %v1149_v17 = vmul.f32 %v1145_v16, %v2201_v10 }
 0x9ed   :  { %v1151_v18 = vadd.f32 1e-12, %v1149_v17 }
 0x9ef   :  { %1975 = vrsqrt.f32 %v1151_v18  ;;  %vm1159_vm9 = vweird.f32 %v1151_v18 }
 0x9f2   :  { %v1148_v20 = vpop.xlane.xlu1 %1147  ;;  %v2532_v46 = vpop.permute.xlu2 %1188 }
 0x9f3   :  { %v1150_v21 = vmul.f32 %v1148_v20, %v2201_v10 }
 0x9f5   :  { %v1976_v22 = vpop.eup %1975  ;;  %v1152_v23 = vadd.f32 1e-12, %v1150_v21  ;;  %v2542_v21 = vld [vmem:[#allocation5] sm:$0xff] }
 0x9f6   :  { %v1154_v43 = vmul.f32 %v1976_v22, %v1151_v18  ;;  %vm1160_vm8 = vweird.f32 %v1976_v22 }
 0x9f7   :  { %1977 = vrsqrt.f32 %v1152_v23  ;;  %vm1161_vm3 = vmor %vm1159_vm9, %vm1160_vm8  ;;  %vm1169_vm2 = vweird.f32 %v1152_v23  ;;  %vm1281_vm8 = vcmask 1046528   ;;  %vm1317_vm9 = vcmask 1045504  }
 0x9f8   :  { %v1155_v24 = vmul.f32 %v1976_v22, %v1154_v43  ;;  %v1575_v43 = vld [vmem:[#allocation7 + $0xe0] sm:$0xff] }
 0x9f9   :  { %1595 = vmatpush.msrb.mxu0 %v1575_v43 }
 0x9fa   :  { %v1156_v11 = vmul.f32 0.5, %v1155_v24  ;;  %v1574_v24 = vld [vmem:[#allocation7 + $0xa0] sm:$0xff] }
 0x9fb   :  { %1596 = vmatpush.msrb.mxu0 %v1574_v24 }
 0x9fc   :  { %v1157_v12 = vsub.f32 1.5, %v1156_v11  ;;  %v2545_v11 = vperm.slane %v2542_v21, 1 }
 0x9fd   :  { %v1978_v25 = vpop.eup %1977 }
 0x9fe   :  { %v1158_v26 = vmul.f32 %v1976_v22, %v1157_v12  ;;  %v1164_v63 = vmul.f32 %v1978_v25, %v1152_v23  ;;  %vm1170_vm1 = vweird.f32 %v1978_v25  ;;  %v2548_v12 = vperm.slane %v2542_v21, 2 }
 0x9ff   :  { %vm1171_vm4 = vmor %vm1169_vm2, %vm1170_vm1  ;;  %vm1357_vm1 = vcmask 1043456   ;;  %vm1377_vm2 = vcmask 1042432  }
 0xa00   :  { %v1165_v31 = vmul.f32 %v1978_v25, %v1164_v63  ;;  %v1162_v32 = vsel %vm1161_vm3, %v1976_v22, %v1158_v26  ;;  %v1573_v26 = vld [vmem:[#allocation7 + $0x60] sm:$0xff]  ;;  %v1286_v63 = vperm.slane %v2542_v21, 0  ;;  %vm1337_vm3 = vcmask 1044480  }
 0xa01   :  { %v1173_v34 = vmul.f32 %v1162_v32, %v1139_v5  ;;  %1597 = vmatpush.msrb.mxu0 %v1573_v26 }
 0xa02   :  { %v1166_v45 = vmul.f32 0.5, %v1165_v31 }
 0xa03   :  { %v1176_v19 = vmul.f32 %v1175_v60, %v1173_v34 }
 0xa04   :  { %v1167_v35 = vsub.f32 1.5, %v1166_v45 }
 0xa05   :  { %v1179_v37 = vadd.f32 %v1178_v33, %v1176_v19 }
 0xa06   :  { %v1168_v27 = vmul.f32 %v1978_v25, %v1167_v35  ;;  %v2563_v35 = vperm.slane %v2542_v21, 4 }
 0xa07   :  { %v1191_v38 = vmul.f32 %v2528_v50, %v1179_v37 }
 0xa08   :  { %v1172_v40 = vsel %vm1171_vm4, %v1978_v25, %v1168_v27  ;;  %vm1397_vm4 = vcmask 1041408  }
 0xa09   :  { %1882 = vmatmul.msk.f32.vlgmr.msrb.gmra.mxu3 %vm83_vm0, %v1191_v38  ;;  %v1174_v41 = vmul.f32 %v1172_v40, %v1140_v3 }
 0xa0b   :  { %v1177_v42 = vmul.f32 %v1175_v60, %v1174_v41  ;;  %v2552_v60 = vperm.slane %v2542_v21, 3  ;;  %v2569_v41 = vld [vmem:[#allocation5 + $0x8] sm:$0xff] }
 0xa0d   :  { %v1180_v47 = vadd.f32 %v1178_v33, %v1177_v42  ;;  %v1572_v33 = vld [vmem:[#allocation7 + $0x20] sm:$0xff]  ;;  %v2572_v42 = vperm.slane %v2569_v41, 1 }
 0xa0e   :  { %1598 = vmatpush.msrb.mxu0 %v1572_v33 }
 0xa0f   :  { %v1192_v0 = vmul.f32 %v2532_v46, %v1180_v47 }
 0xa11   :  { %1883 = vmatmul.msk.f32.gmra.mxu3 %vm83_vm0, %v1192_v0 }
 0xa8c   :  { %v1221_v49 = vpop.f32.mrf.mxu3 }
 0xa8d   :  { %v2537_v1 = vadd.f32 %v1221_v49, %v1197_v48 }
 0xa8f   :  { %v1884_v52 = vmul.f32 -1.442695, %v2537_v1 }
 0xa91   :  { %1979 = vpow2.f32 %v1884_v52 }
 0xa94   :  { %v1224_v54 = vpop.f32.mrf.mxu3 }
 0xa95   :  { %v1225_v55 = vadd.f32 %v1224_v54, %v1197_v48  ;;  %v2579_v54 = vperm.slane %v2569_v41, 2 }
 0xa97   :  { %v1980_v56 = vpop.eup %1979  ;;  %v1885_v57 = vmul.f32 -1.442695, %v1225_v55 }
 0xa98   :  { %v1233_v58 = vadd.f32 1.0, %v1980_v56 }
 0xa99   :  { %1981 = vpow2.f32 %v1885_v57 }
 0xa9a   :  { %1983 = vrcp.f32 %v1233_v58  ;;  %v1246_v5 = vand.u32 2147483648, %v1233_v58  ;;  %v1244_v7 = vand.u32 2147483647, %v1233_v58  ;;  %vm1240_vm6 = vweird.f32 %v1233_v58 }
 0xa9c   :  { %v1247_v3 = vor.u32 1.1754944e-38, %v1246_v5  ;;  %vm1245_vm10 = vcmp.eq.f32.partialorder %v1244_v7, 8.507059e+37 }
 0xa9f   :  { %v1982_v59 = vpop.eup %1981 }
 0xaa0   :  { %v1984_v2 = vpop.eup %1983  ;;  %v1234_v61 = vadd.f32 1.0, %v1982_v59  ;;  %v2588_v59 = vperm.slane %v2542_v21, 5 }
 0xaa1   :  { %v1236_v39 = vmul.f32 %v1984_v2, %v1233_v58  ;;  %vm1241_vm5 = vweird.f32 %v1984_v2 }
 0xaa2   :  { %1985 = vrcp.f32 %v1234_v61  ;;  %vm1242_vm7 = vmor %vm1240_vm6, %vm1241_vm5  ;;  %v1261_v51 = vand.u32 2147483648, %v1234_v61  ;;  %v1259_v15 = vand.u32 2147483647, %v1234_v61  ;;  %vm1255_vm14 = vweird.f32 %v1234_v61 }
 0xaa3   :  { %v1237_v4 = vsub.f32 1.0, %v1236_v39  ;;  %vm1417_vm5 = vcmask 1040384  }
 0xaa4   :  { %v1262_v17 = vor.u32 1.1754944e-38, %v1261_v51  ;;  %vm1260_vm11 = vcmp.eq.f32.partialorder %v1259_v15, 8.507059e+37 }
 0xaa5   :  { %v1238_v6 = vmul.f32 %v1984_v2, %v1237_v4 }
 0xaa7   :  { %v1239_v44 = vadd.f32 %v1984_v2, %v1238_v6  ;;  %v2598_v6 = vmul.f32 0.0, %v2572_v42 }
 0xaa8   :  { %v1986_v8 = vpop.eup %1985 }
 0xaa9   :  { %v1243_v9 = vsel %vm1242_vm7, %v1984_v2, %v1239_v44  ;;  %v1251_v30 = vmul.f32 %v1986_v8, %v1234_v61  ;;  %vm1256_vm13 = vweird.f32 %v1986_v8  ;;  %v2591_v2 = vperm.slane %v2542_v21, 6 }
 0xaaa   :  { %v1248_v29 = vsel %vm1245_vm10, %v1247_v3, %v1243_v9  ;;  %vm1257_vm15 = vmor %vm1255_vm14, %vm1256_vm13  ;;  %v2594_v61 = vperm.slane %v2542_v21, 7  ;;  %v2601_v44 = vmul.f32 0.0, %v2579_v54  ;;  %v2607_v3 = vperm.slane %v2569_v41, 4 }
 0xaab   :  { %1267 = vrot.lane.b32.xlu1 %v1248_v29, %s2129_s20  ;;  %v1252_v14 = vsub.f32 1.0, %v1251_v30  ;;  %v1428_v29 = vperm.slane %v2569_v41, 0 }
 0xaac   :  { %v1457_v43 = vrot.slane %v2601_v44, 2 }
 0xaad   :  { %v1253_v13 = vmul.f32 %v1986_v8, %v1252_v14  ;;  %v2611_v14 = vperm.slane %v2569_v41, 5 }
 0xaaf   :  { %v1254_v16 = vadd.f32 %v1986_v8, %v1253_v13  ;;  %v2630_v33 = vmul.f32 0.0, %v2611_v14 }
 0xab1   :  { %v1258_v18 = vsel %vm1257_vm15, %v1986_v8, %v1254_v16 }
 0xab2   :  { %v1263_v20 = vsel %vm1260_vm11, %v1262_v17, %v1258_v18 }
 0xab3   :  { %1269 = vrot.lane.b32.xlu2 %v1263_v20, %s2129_s20  ;;  %v1441_v20 = vrot.slane %v2598_v6, 1 }
 0xb0d   :  { %v1270_v22 = vpop.permute.xlu2 %1269 }
 0xb0e   :  { %v1274_v23 = vmul.f32 %v1270_v22, %v1225_v55  ;;  %v2582_v55 = vperm.slane %v2569_v41, 3 }
 0xb10   :  { %v1278_v25 = vrot.slane %v1274_v23, 1  ;;  %v2604_v8 = vmul.f32 0.0, %v2582_v55 }
 0xb12   :  { %v1283_v31 = vsel %vm1281_vm8, 0.0, %v1278_v25  ;;  %v2556_v32 = vsel %vm1281_vm8, %v1278_v25, 0.0  ;;  %v1473_v24 = vrot.slane %v2604_v8, 3  ;;  %v2626_v25 = vmul.f32 0.0, %v2607_v3 }
 0xb13   :  { %v1292_v34 = vmul.f32 %v2545_v11, %v1283_v31  ;;  %v1293_v45 = vmul.f32 %v2545_v11, %v2556_v32  ;;  %v1311_v19 = vmul.f32 %v2548_v12, %v1283_v31  ;;  %v1312_v37 = vmul.f32 %v2548_v12, %v2556_v32 }
 0xb14   :  { %v1288_v27 = vmul.f32 %v1286_v63, %v1283_v31  ;;  %v1331_v48 = vmul.f32 %v2552_v60, %v1283_v31  ;;  %v1332_v49 = vmul.f32 %v2552_v60, %v2556_v32  ;;  %v1351_v57 = vmul.f32 %v2563_v35, %v1283_v31 }
 0xb15   :  { %v1301_v38 = vrot.slane %v1292_v34, 1  ;;  %v1302_v40 = vrot.slane %v1293_v45, 1  ;;  %v1321_v47 = vrot.slane %v1311_v19, 2  ;;  %v1322_v0 = vrot.slane %v1312_v37, 2 }
 0xb16   :  { %v1352_v58 = vmul.f32 %v2563_v35, %v2556_v32  ;;  %v1341_v4 = vrot.slane %v1331_v48, 3  ;;  %v1342_v5 = vrot.slane %v1332_v49, 3  ;;  %v1361_v9 = vrot.slane %v1351_v57, 4 }
 0xb17   :  { %v1303_v52 = vsel %vm1281_vm8, %v1301_v38, %v1302_v40  ;;  %v1323_v39 = vsel %vm1317_vm9, %v1321_v47, %v1322_v0  ;;  %v1371_v51 = vmul.f32 %v2588_v59, %v1283_v31  ;;  %v1391_v13 = vmul.f32 %v2591_v2, %v1283_v31 }
 0xb18   :  { %v1307_v56 = vadd.f32 %v1303_v52, %v1288_v27  ;;  %v1362_v30 = vrot.slane %v1352_v58, 4  ;;  %v2616_v15 = vmul.f32 %v2594_v61, %v1283_v31  ;;  %v1343_v17 = vsel %vm1337_vm3, %v1341_v4, %v1342_v5 }
 0xb19   :  { %v1372_v22 = vmul.f32 %v2588_v59, %v2556_v32  ;;  %v1381_v34 = vrot.slane %v1371_v51, 5  ;;  %v1401_v45 = vrot.slane %v1391_v13, 6  ;;  %v1392_v37 = vmul.f32 %v2591_v2, %v2556_v32 }
 0xb1a   :  { %v1327_v7 = vadd.f32 %v1323_v39, %v1307_v56  ;;  %v1363_v26 = vsel %vm1357_vm1, %v1361_v9, %v1362_v30  ;;  %v1421_v19 = vrot.slane %v2616_v15, 7  ;;  %v1412_v47 = vmul.f32 %v2594_v61, %v2556_v32 }
 0xb1b   :  { %v1382_v40 = vrot.slane %v1372_v22, 5 }
 0xb1c   :  { %v1347_v23 = vadd.f32 %v1343_v17, %v1327_v7  ;;  %v1422_v22 = vrot.slane %v1412_v47, 7 }
 0xb1d   :  { %v1268_v16 = vpop.permute.xlu1 %1267  ;;  %v1383_v51 = vsel %vm1377_vm2, %v1381_v34, %v1382_v40 }
 0xb1e   :  { %v1273_v18 = vmul.f32 %v1268_v16, %v2537_v1  ;;  %v2633_v1 = vperm.slane %v2569_v41, 6  ;;  %v1367_v0 = vadd.f32 %v1363_v26, %v1347_v23  ;;  %v1436_v23 = vmul.f32 %v2572_v42, %v2556_v32 }
 0xb20   :  { %v1277_v31 = vrot.slane %v1273_v18, 1  ;;  %v1387_v18 = vadd.f32 %v1383_v51, %v1367_v0 }
 0xb22   :  { %v1282_v27 = vsel %vm1281_vm8, 0.0, %v1277_v31  ;;  %v2640_v38 = vsel %vm1281_vm8, %v1277_v31, 0.0 }
 0xb23   :  { %v1290_v48 = vmul.f32 %v2545_v11, %v1282_v27  ;;  %v1291_v49 = vmul.f32 %v2545_v11, %v2640_v38  ;;  %v1309_v52 = vmul.f32 %v2548_v12, %v1282_v27  ;;  %v1310_v56 = vmul.f32 %v2548_v12, %v2640_v38 }
 0xb24   :  { %v1329_v57 = vmul.f32 %v2552_v60, %v1282_v27  ;;  %v1330_v58 = vmul.f32 %v2552_v60, %v2640_v38  ;;  %v1349_v39 = vmul.f32 %v2563_v35, %v1282_v27  ;;  %v1350_v9 = vmul.f32 %v2563_v35, %v2640_v38 }
 0xb25   :  { %v1298_v4 = vrot.slane %v1290_v48, 1  ;;  %v1299_v5 = vrot.slane %v1291_v49, 1  ;;  %v1318_v7 = vrot.slane %v1309_v52, 2  ;;  %v1287_v11 = vmul.f32 %v1286_v63, %v1282_v27 }
 0xb26   :  { %v1319_v30 = vrot.slane %v1310_v56, 2  ;;  %v1402_v12 = vrot.slane %v1392_v37, 6  ;;  %v1338_v15 = vrot.slane %v1329_v57, 3  ;;  %v1339_v16 = vrot.slane %v1330_v58, 3 }
 0xb27   :  { %v1300_v13 = vsel %vm1281_vm8, %v1298_v4, %v1299_v5  ;;  %v1369_v60 = vmul.f32 %v2588_v59, %v1282_v27  ;;  %v1358_v21 = vrot.slane %v1349_v39, 4  ;;  %v1359_v63 = vrot.slane %v1350_v9, 4 }
 0xb28   :  { %v1306_v17 = vadd.f32 %v1300_v13, %v1287_v11  ;;  %v1320_v35 = vsel %vm1317_vm9, %v1318_v7, %v1319_v30  ;;  %v1389_v26 = vmul.f32 %v2591_v2, %v1282_v27  ;;  %v1370_v34 = vmul.f32 %v2588_v59, %v2640_v38 }
 0xb29   :  { %v1390_v37 = vmul.f32 %v2591_v2, %v2640_v38  ;;  %v1403_v40 = vsel %vm1397_vm4, %v1401_v45, %v1402_v12  ;;  %v1340_v47 = vsel %vm1337_vm3, %v1338_v15, %v1339_v16  ;;  %v1378_v0 = vrot.slane %v1369_v60, 5 }
 0xb2a   :  { %v1326_v31 = vadd.f32 %v1320_v35, %v1306_v17  ;;  %v1409_v48 = vmul.f32 %v2594_v61, %v1282_v27  ;;  %v1410_v49 = vmul.f32 %v2594_v61, %v2640_v38  ;;  %v1379_v56 = vrot.slane %v1370_v34, 5 }
 0xb2b   :  { %v1489_v57 = vrot.slane %v2626_v25, 4  ;;  %v1407_v58 = vadd.f32 %v1403_v40, %v1387_v18  ;;  %v1360_v59 = vsel %vm1357_vm1, %v1358_v21, %v1359_v63  ;;  %v1398_v39 = vrot.slane %v1389_v26, 6 }
 0xb2c   :  { %v1346_v52 = vadd.f32 %v1340_v47, %v1326_v31  ;;  %v1399_v4 = vrot.slane %v1390_v37, 6  ;;  %v1452_v2 = vmul.f32 %v2579_v54, %v2556_v32  ;;  %v1423_v5 = vsel %vm1417_vm5, %v1421_v19, %v1422_v22 }
 0xb2d   :  { %v1443_v7 = vrot.slane %v1436_v23, 1  ;;  %v1468_v27 = vmul.f32 %v2582_v55, %v2556_v32  ;;  %v1418_v61 = vrot.slane %v1409_v48, 7  ;;  %v1419_v9 = vrot.slane %v1410_v49, 7 }
 0xb2e   :  { %v1366_v45 = vadd.f32 %v1360_v59, %v1346_v52  ;;  %v1380_v11 = vsel %vm1377_vm2, %v1378_v0, %v1379_v56  ;;  %v1434_v30 = vmul.f32 %v2572_v42, %v2640_v38  ;;  %v1427_v12 = vadd.f32 %v1423_v5, %v1407_v58 }
 0xb2f   :  { %v1430_v13 = vmul.f32 %v1428_v29, %v2556_v32  ;;  %v1484_v19 = vmul.f32 %v2607_v3, %v2556_v32  ;;  %v1400_v15 = vsel %vm1397_vm4, %v1398_v39, %v1399_v4  ;;  %v1450_v16 = vmul.f32 %v2579_v54, %v2640_v38 }
 0xb30   :  { %v1386_v51 = vadd.f32 %v1380_v11, %v1366_v45  ;;  %v1515_v60 = vmul.f32 0.0, %v2633_v1  ;;  %v1459_v17 = vrot.slane %v1452_v2, 2  ;;  %v1444_v42 = vsel %vm1281_vm8, %v1443_v7, %v1441_v20 }
 0xb31   :  { %v1432_v22 = vadd.f32 %v1430_v13, %v1427_v12  ;;  %v1475_v23 = vrot.slane %v1468_v27, 3  ;;  %v1420_v35 = vsel %vm1417_vm5, %v1418_v61, %v1419_v9  ;;  %v1440_v21 = vrot.slane %v1434_v30, 1 }
 0xb32   :  { %v1406_v18 = vadd.f32 %v1400_v15, %v1386_v51  ;;  %v1466_v63 = vmul.f32 %v2582_v55, %v2640_v38  ;;  %v1500_v26 = vmul.f32 %v2611_v14, %v2556_v32  ;;  %v1429_v31 = vmul.f32 %v1428_v29, %v2640_v38 }
 0xb33   :  { %v1448_v34 = vadd.f32 %v1444_v42, %v1432_v22  ;;  %v1491_v37 = vrot.slane %v1484_v19, 4  ;;  %v1456_v40 = vrot.slane %v1450_v16, 2  ;;  %v1482_v47 = vmul.f32 %v2607_v3, %v2640_v38 }
 0xb34   :  { %v1426_v54 = vadd.f32 %v1420_v35, %v1406_v18  ;;  %v1460_v0 = vsel %vm1317_vm9, %v1459_v17, %v1457_v43  ;;  %v1516_v55 = vmul.f32 %v2633_v1, %v2556_v32  ;;  %v1505_v49 = vrot.slane %v2630_v33, 5 }
 0xb35   :  { %v1464_v52 = vadd.f32 %v1460_v0, %v1448_v34  ;;  %v1476_v41 = vsel %vm1337_vm3, %v1475_v23, %v1473_v24  ;;  %v1442_v29 = vsel %vm1281_vm8, %v1440_v21, %v1441_v20  ;;  %v1472_v3 = vrot.slane %v1466_v63, 3 }
 0xb36   :  { %v1431_v48 = vadd.f32 %v1429_v31, %v1426_v54  ;;  %v1498_v56 = vmul.f32 %v2611_v14, %v2640_v38  ;;  %v1507_v58 = vrot.slane %v1500_v26, 5  ;;  %v1521_v39 = vrot.slane %v1515_v60, 6 }
 0xb37   :  { %v1480_v32 = vadd.f32 %v1476_v41, %v1464_v52  ;;  %v1492_v33 = vsel %vm1357_vm1, %v1491_v37, %v1489_v57  ;;  %v1458_v4 = vsel %vm1317_vm9, %v1456_v40, %v1457_v43  ;;  %v1488_v2 = vrot.slane %v1482_v47, 4 }
 0xb38   :  { %v1447_v59 = vadd.f32 %v1442_v29, %v1431_v48  ;;  %v1514_v6 = vmul.f32 %v2633_v1, %v2640_v38  ;;  %v1523_v20 = vrot.slane %v1516_v55, 6  ;;  %v1474_v14 = vsel %vm1337_vm3, %v1472_v3, %v1473_v24 }
 0xb39   :  { %v1496_v5 = vadd.f32 %v1492_v33, %v1480_v32  ;;  %v1504_v7 = vrot.slane %v1498_v56, 5  ;;  %v1508_v27 = vsel %vm1377_vm2, %v1507_v58, %v1505_v49  ;;  %v1529_v9 = vperm.slane %v2497_v53, 6 }
 0xb3a   :  { %v1463_v45 = vadd.f32 %v1458_v4, %v1447_v59  ;;  %v1490_v43 = vsel %vm1357_vm1, %v1488_v2, %v1489_v57  ;;  %v1520_v11 = vrot.slane %v1514_v6, 6  ;;  %v1524_v1 = vsel %vm1397_vm4, %v1523_v20, %v1521_v39 }
 0xb3b   :  { %v1512_v44 = vadd.f32 %v1508_v27, %v1496_v5  ;;  %v1506_v8 = vsel %vm1377_vm2, %v1504_v7, %v1505_v49  ;;  %v1576_v56 = vperm.slane %v2497_v53, 7 }
 0xb3c   :  { %v1479_v61 = vadd.f32 %v1474_v14, %v1463_v45  ;;  %v1522_v12 = vsel %vm1397_vm4, %v1520_v11, %v1521_v39  ;;  %v1661_v11 = vld [vmem:[#allocation7 + $0x68] sm:$0xff] }
 0xb3d   :  { %v1528_v30 = vadd.f32 %v1524_v1, %v1512_v44  ;;  %v1662_v44 = vld [vmem:[#allocation7 + $0xa8] sm:$0xff] }
 0xb3e   :  { %v1495_v38 = vadd.f32 %v1490_v43, %v1479_v61 }
 0xb3f   :  { %v1531_v24 = vadd.f32 %v1529_v9, %v1528_v30 }
 0xb40   :  { %v1511_v51 = vadd.f32 %v1506_v8, %v1495_v38  ;;  %v1660_v38 = vld [vmem:[#allocation7 + $0x28] sm:$0xff] }
 0xb41   :  { %v1887_v19 = vmul.f32 -1.442695, %v1531_v24 }
 0xb42   :  { %v1527_v13 = vadd.f32 %v1522_v12, %v1511_v51 }
 0xb43   :  { %1987 = vpow2.f32 %v1887_v19 }
 0xb44   :  { %v1530_v15 = vadd.f32 %v1529_v9, %v1527_v13  ;;  %v1663_v9 = vld [vmem:[#allocation7 + $0xe8] sm:$0xff] }
 0xb45   :  { %1683 = vmatpush.msra.mxu1 %v1663_v9 }
 0xb46   :  { %v1886_v16 = vmul.f32 -1.442695, %v1530_v15 }
 0xb47   :  { %1684 = vmatpush.msra.mxu1 %v1662_v44 }
 0xb48   :  { %1989 = vpow2.f32 %v1886_v16 }
 0xb49   :  { %v1988_v25 = vpop.eup %1987  ;;  %1685 = vmatpush.msra.mxu1 %v1661_v11 }
 0xb4a   :  { %v1539_v60 = vadd.f32 1.0, %v1988_v25 }
 0xb4b   :  { %1686 = vmatpush.msra.mxu1 %v1660_v38 }
 0xb4c   :  { %1991 = vrcp.f32 %v1539_v60  ;;  %v1566_v55 = vand.u32 2147483648, %v1539_v60  ;;  %vm1560_vm15 = vweird.f32 %v1539_v60  ;;  %v1564_v49 = vand.u32 2147483647, %v1539_v60 }
 0xb4e   :  { %v1990_v57 = vpop.eup %1989  ;;  %v1567_v41 = vor.u32 1.1754944e-38, %v1566_v55  ;;  %vm1565_vm8 = vcmp.eq.f32.partialorder %v1564_v49, 8.507059e+37 }
 0xb4f   :  { %v1538_v17 = vadd.f32 1.0, %v1990_v57 }
 0xb51   :  { %1993 = vrcp.f32 %v1538_v17  ;;  %v1551_v63 = vand.u32 2147483648, %v1538_v17  ;;  %v1549_v54 = vand.u32 2147483647, %v1538_v17  ;;  %vm1545_vm7 = vweird.f32 %v1538_v17 }
 0xb52   :  { %v1992_v18 = vpop.eup %1991 }
 0xb53   :  { %v1556_v22 = vmul.f32 %v1992_v18, %v1539_v60  ;;  %v1552_v37 = vor.u32 1.1754944e-38, %v1551_v63  ;;  %vm1550_vm13 = vcmp.eq.f32.partialorder %v1549_v54, 8.507059e+37  ;;  %vm1561_vm14 = vweird.f32 %v1992_v18 }
 0xb54   :  { %vm1562_vm11 = vmor %vm1560_vm15, %vm1561_vm14 }
 0xb55   :  { %v1557_v35 = vsub.f32 1.0, %v1556_v22 }
 0xb57   :  { %v1994_v42 = vpop.eup %1993  ;;  %v1558_v31 = vmul.f32 %v1992_v18, %v1557_v35 }
 0xb58   :  { %v1541_v23 = vmul.f32 %v1994_v42, %v1538_v17  ;;  %vm1546_vm6 = vweird.f32 %v1994_v42  ;;  %v1654_v17 = vperm.slane %v2524_v28, 5 }
 0xb59   :  { %vm1547_vm10 = vmor %vm1545_vm7, %vm1546_vm6  ;;  %v1559_v47 = vadd.f32 %v1992_v18, %v1558_v31 }
 0xb5a   :  { %v1542_v21 = vsub.f32 1.0, %v1541_v23  ;;  %v1657_v23 = vperm.slane %v2524_v28, 6 }
 0xb5b   :  { %v1563_v52 = vsel %vm1562_vm11, %v1992_v18, %v1559_v47  ;;  %v2766_v47 = vld [vmem:[#allocation5 + $0x20] sm:$0x3] }
 0xb5c   :  { %v1543_v26 = vmul.f32 %v1994_v42, %v1542_v21  ;;  %v1568_v29 = vsel %vm1565_vm8, %v1567_v41, %v1563_v52  ;;  %v1741_v52 = vld [vmem:[#allocation7 + $0x1f8] sm:$0xff] }
 0xb5d   :  { %v1571_v3 = vmul.f32 %v1568_v29, %v1531_v24  ;;  %v1740_v41 = vld [vmem:[#allocation7 + $0x1b8] sm:$0xff]  ;;  %1756 = vmatpush.msra.mxu2 %v1741_v52 }
 0xb5e   :  { %v1544_v34 = vadd.f32 %v1994_v42, %v1543_v26 }
 0xb5f   :  { %1757 = vmatpush.msra.mxu2 %v1740_v41 }
 0xb60   :  { %v1548_v40 = vsel %vm1547_vm10, %v1994_v42, %v1544_v34 }
 0xb61   :  { %v1553_v0 = vsel %vm1550_vm13, %v1552_v37, %v1548_v40 }
 0xb62   :  { %v1570_v48 = vmul.f32 %v1553_v0, %v1530_v15  ;;  %v1664_v0 = vperm.slane %v2766_v47, 0 }
 0xb64   :  { %1888 = vmatmul.msk.f32.vlgmr.msrb.gmra.mxu0 %vm83_vm0, %v1570_v48 }
 0xb6c   :  { %1889 = vmatmul.msk.f32.gmra.mxu0 %vm83_vm0, %v1571_v3 }
 0xbe1   :  { %v1600_v58 = vpop.f32.mrf.mxu0 }
 0xbe2   :  { %v1601_v59 = vadd.f32 %v1600_v58, %v1576_v56 }
 0xbe4   :  { %v1606_v39 = vmul.f32 %v1601_v59, %v2528_v50 }
 0xbe6   :  { %v2744_v32 = vadd.f32 %v1606_v39, %v2501_v36  ;;  %v1738_v39 = vld [vmem:[#allocation7 + $0x138] sm:$0xff] }
 0xbe8   :  { %v1610_v33 = vsel %vm83_vm0, %v2744_v32, 0.0 }
 0xbe9   :  { %1611 = vadd.xlane.f32.xlu1 %v1610_v33  ;;  %v1603_v4 = vpop.f32.mrf.mxu0 }
 0xbea   :  { %v1604_v2 = vadd.f32 %v1603_v4, %v1576_v56  ;;  %v1739_v56 = vld [vmem:[#allocation7 + $0x178] sm:$0xff] }
 0xbeb   :  { %1758 = vmatpush.msra.mxu2 %v1739_v56  ;;  %v1737_v4 = vld [vmem:[#allocation7 + $0xf8] sm:$0xff] }
 0xbec   :  { %v1607_v6 = vmul.f32 %v1604_v2, %v2532_v46  ;;  %v1736_v2 = vld [vmem:[#allocation7 + $0xb8] sm:$0xff] }
 0xbed   :  { %1759 = vmatpush.msra.mxu2 %v1738_v39 }
 0xbee   :  { %v2750_v20 = vadd.f32 %v1607_v6, %v2506_v62  ;;  %v1735_v6 = vld [vmem:[#allocation7 + $0x78] sm:$0xff] }
 0xbef   :  { %1760 = vmatpush.msra.mxu2 %v1737_v4 }
 0xbf0   :  { %v1613_v53 = vsel %vm83_vm0, %v2750_v20, 0.0 }
 0xbf1   :  { %1614 = vadd.xlane.f32.xlu2 %v1613_v53  ;;  %1761 = vmatpush.msra.mxu2 %v1736_v2 }
 0xbf3   :  { %1762 = vmatpush.msra.mxu2 %v1735_v6 }
 0xc5c   :  { %v1612_v45 = vpop.xlane.xlu1 %1611 }
 0xc5d   :  { %v1616_v50 = vmul.f32 %v1612_v45, %v2201_v10  ;;  %v1734_v45 = vld [vmem:[#allocation7 + $0x38] sm:$0xff] }
 0xc5e   :  { %1763 = vmatpush.msra.mxu2 %v1734_v45 }
 0xc5f   :  { %v1618_v36 = vsub.f32 %v2744_v32, %v1616_v50 }
 0xc61   :  { %v1620_v5 = vmul.f32 %v1618_v36, %v1618_v36 }
 0xc63   :  { %v1622_v14 = vsel %vm83_vm0, %v1620_v5, 0.0 }
 0xc64   :  { %1623 = vadd.xlane.f32.xlu0 %v1622_v14  ;;  %v1615_v7 = vpop.xlane.xlu2 %1614 }
 0xc65   :  { %v1617_v27 = vmul.f32 %v1615_v7, %v2201_v10 }
 0xc67   :  { %v1619_v46 = vsub.f32 %v2750_v20, %v1617_v27 }
 0xc69   :  { %v1621_v62 = vmul.f32 %v1619_v46, %v1619_v46 }
 0xc6b   :  { %v1625_v61 = vsel %vm83_vm0, %v1621_v62, 0.0 }
 0xc6c   :  { %1626 = vadd.xlane.f32.xlu1 %v1625_v61 }
 0xcd7   :  { %v1624_v43 = vpop.xlane.xlu0 %1623 }
 0xcd8   :  { %v1628_v1 = vmul.f32 %v1624_v43, %v2201_v10 }
 0xcda   :  { %v1630_v30 = vadd.f32 1e-12, %v1628_v1 }
 0xcdc   :  { %1995 = vrsqrt.f32 %v1630_v30  ;;  %vm1638_vm3 = vweird.f32 %v1630_v30 }
 0xcdf   :  { %v1627_v8 = vpop.xlane.xlu1 %1626 }
 0xce0   :  { %v1629_v51 = vmul.f32 %v1627_v8, %v2201_v10 }
 0xce2   :  { %v1996_v24 = vpop.eup %1995  ;;  %v1631_v12 = vadd.f32 1e-12, %v1629_v51 }
 0xce3   :  { %v1633_v13 = vmul.f32 %v1996_v24, %v1630_v30  ;;  %vm1639_vm9 = vweird.f32 %v1996_v24 }
 0xce4   :  { %1997 = vrsqrt.f32 %v1631_v12  ;;  %vm1640_vm1 = vmor %vm1638_vm3, %vm1639_vm9  ;;  %vm1648_vm4 = vweird.f32 %v1631_v12 }
 0xce5   :  { %v1634_v19 = vmul.f32 %v1996_v24, %v1633_v13 }
 0xce7   :  { %v1635_v15 = vmul.f32 0.5, %v1634_v19 }
 0xce9   :  { %v1636_v16 = vsub.f32 1.5, %v1635_v15 }
 0xcea   :  { %v1998_v25 = vpop.eup %1997 }
 0xceb   :  { %v1637_v60 = vmul.f32 %v1996_v24, %v1636_v16  ;;  %v1643_v57 = vmul.f32 %v1998_v25, %v1631_v12  ;;  %vm1649_vm2 = vweird.f32 %v1998_v25  ;;  %v1773_v16 = vperm.slane %v2766_v47, 1 }
 0xcec   :  { %vm1650_vm5 = vmor %vm1648_vm4, %vm1649_vm2 }
 0xced   :  { %v1641_v18 = vsel %vm1640_vm1, %v1996_v24, %v1637_v60  ;;  %v1644_v22 = vmul.f32 %v1998_v25, %v1643_v57 }
 0xcee   :  { %v1652_v42 = vmul.f32 %v1641_v18, %v1618_v36 }
 0xcef   :  { %v1645_v35 = vmul.f32 0.5, %v1644_v22 }
 0xcf0   :  { %v1655_v21 = vmul.f32 %v1654_v17, %v1652_v42 }
 0xcf1   :  { %v1646_v63 = vsub.f32 1.5, %v1645_v35 }
 0xcf2   :  { %v1658_v26 = vadd.f32 %v1657_v23, %v1655_v21 }
 0xcf3   :  { %v1647_v54 = vmul.f32 %v1998_v25, %v1646_v63 }
 0xcf4   :  { %1890 = vmatmul.msk.f32.vlgmr.msra.gmra.mxu1 %vm83_vm0, %v1658_v26 }
 0xcf5   :  { %v1651_v31 = vsel %vm1650_vm5, %v1998_v25, %v1647_v54 }
 0xcf6   :  { %v1653_v34 = vmul.f32 %v1651_v31, %v1619_v46 }
 0xcf8   :  { %v1656_v37 = vmul.f32 %v1654_v17, %v1653_v34 }
 0xcfa   :  { %v1659_v40 = vadd.f32 %v1657_v23, %v1656_v37 }
 0xcfc   :  { %1891 = vmatmul.msk.f32.gmra.mxu1 %vm83_vm0, %v1659_v40 }
 0xd71   :  { %v1688_v55 = vpop.f32.mrf.mxu1 }
 0xd72   :  { %v1689_v48 = vadd.f32 %v1688_v55, %v1664_v0 }
 0xd74   :  { %v1892_v49 = vmul.f32 -1.442695, %v1689_v48 }
 0xd76   :  { %1999 = vpow2.f32 %v1892_v49 }
 0xd79   :  { %v1691_v29 = vpop.f32.mrf.mxu1 }
 0xd7a   :  { %v1692_v3 = vadd.f32 %v1691_v29, %v1664_v0 }
 0xd7c   :  { %v2000_v58 = vpop.eup %1999  ;;  %v1893_v59 = vmul.f32 -1.442695, %v1692_v3 }
 0xd7d   :  { %v1700_v33 = vadd.f32 1.0, %v2000_v58 }
 0xd7e   :  { %2001 = vpow2.f32 %v1893_v59 }
 0xd7f   :  { %2003 = vrcp.f32 %v1700_v33  ;;  %v1713_v7 = vand.u32 2147483648, %v1700_v33  ;;  %v1711_v46 = vand.u32 2147483647, %v1700_v33  ;;  %vm1707_vm7 = vweird.f32 %v1700_v33 }
 0xd81   :  { %v1714_v9 = vor.u32 1.1754944e-38, %v1713_v7  ;;  %vm1712_vm13 = vcmp.eq.f32.partialorder %v1711_v46, 8.507059e+37 }
 0xd84   :  { %v2002_v53 = vpop.eup %2001 }
 0xd85   :  { %v2004_v50 = vpop.eup %2003  ;;  %v1701_v36 = vadd.f32 1.0, %v2002_v53  ;;  %v2014_v53 = vld [vmem:[#allocation5 + $0x18] sm:$0xff] }
 0xd86   :  { %v1703_v5 = vmul.f32 %v2004_v50, %v1700_v33  ;;  %vm1708_vm6 = vweird.f32 %v2004_v50  ;;  %v1820_v33 = vperm.slane %v2524_v28, 7 }
 0xd87   :  { %2005 = vrcp.f32 %v1701_v36  ;;  %vm1709_vm10 = vmor %vm1707_vm7, %vm1708_vm6  ;;  %v1728_v30 = vand.u32 2147483648, %v1701_v36  ;;  %v1726_v51 = vand.u32 2147483647, %v1701_v36  ;;  %vm1722_vm15 = vweird.f32 %v1701_v36 }
 0xd88   :  { %v1704_v14 = vsub.f32 1.0, %v1703_v5 }
 0xd89   :  { %v1729_v12 = vor.u32 1.1754944e-38, %v1728_v30  ;;  %vm1727_vm8 = vcmp.eq.f32.partialorder %v1726_v51, 8.507059e+37 }
 0xd8a   :  { %v1705_v27 = vmul.f32 %v2004_v50, %v1704_v14 }
 0xd8c   :  { %v1706_v62 = vadd.f32 %v2004_v50, %v1705_v27 }
 0xd8d   :  { %v2006_v61 = vpop.eup %2005 }
 0xd8e   :  { %v1710_v44 = vsel %vm1709_vm10, %v2004_v50, %v1706_v62  ;;  %v1718_v43 = vmul.f32 %v2006_v61, %v1701_v36  ;;  %vm1723_vm14 = vweird.f32 %v2006_v61 }
 0xd8f   :  { %v1715_v11 = vsel %vm1712_vm13, %v1714_v9, %v1710_v44  ;;  %vm1724_vm11 = vmor %vm1722_vm15, %vm1723_vm14 }
 0xd90   :  { %v1732_v1 = vmul.f32 %v1715_v11, %v1689_v48  ;;  %v1719_v38 = vsub.f32 1.0, %v1718_v43 }
 0xd92   :  { %v1720_v8 = vmul.f32 %v2006_v61, %v1719_v38  ;;  %1894 = vmatmul.msk.f32.vlgmr.msra.gmra.mxu2 %vm223_vm12, %v1732_v1 }
 0xd94   :  { %v1721_v24 = vadd.f32 %v2006_v61, %v1720_v8 }
 0xd96   :  { %v1725_v13 = vsel %vm1724_vm11, %v2006_v61, %v1721_v24 }
 0xd97   :  { %v1730_v19 = vsel %vm1727_vm8, %v1729_v12, %v1725_v13 }
 0xd98   :  { %v1733_v15 = vmul.f32 %v1730_v19, %v1692_v3 }
 0xd9a   :  { %1895 = vmatmul.msk.f32.gmra.mxu2 %vm223_vm12, %v1733_v15 }
 0xe15   :  { %v1765_v25 = vpop.f32.mrf.mxu2 }
 0xe16   :  { %v1771_v60 = vadd.f32 %v1765_v25, %v2744_v32 }
 0xe18   :  { %v1774_v57 = vadd.f32 %v1773_v16, %v1771_v60 }
 0xe1a   :  { %v1776_v17 = vsel %vm83_vm0, %v1774_v57, 0.0 }
 0xe1b   :  { %1777 = vadd.xlane.f32.xlu2 %v1776_v17 }
 0xe1d   :  { %v1768_v18 = vpop.f32.mrf.mxu2 }
 0xe1e   :  { %v1772_v22 = vadd.f32 %v1768_v18, %v2750_v20 }
 0xe20   :  { %v1775_v42 = vadd.f32 %v1773_v16, %v1772_v22 }
 0xe22   :  { %v1779_v23 = vsel %vm83_vm0, %v1775_v42, 0.0 }
 0xe23   :  { %1780 = vadd.xlane.f32.xlu0 %v1779_v23 }
 0xe8e   :  { %v1778_v35 = vpop.xlane.xlu2 %1777 }
 0xe8f   :  { %v1782_v21 = vmul.f32 %v1778_v35, %v2201_v10 }
 0xe91   :  { %v1784_v63 = vsub.f32 %v1774_v57, %v1782_v21 }
 0xe93   :  { %v1786_v26 = vmul.f32 %v1784_v63, %v1784_v63 }
 0xe95   :  { %v1788_v54 = vsel %vm83_vm0, %v1786_v26, 0.0 }
 0xe96   :  { %v1781_v31 = vpop.xlane.xlu0 %1780  ;;  %1789 = vadd.xlane.f32.xlu1 %v1788_v54 }
 0xe97   :  { %v1783_v32 = vmul.f32 %v1781_v31, %v2201_v10 }
 0xe99   :  { %v1785_v34 = vsub.f32 %v1775_v42, %v1783_v32 }
 0xe9b   :  { %v1787_v37 = vmul.f32 %v1785_v34, %v1785_v34 }
 0xe9d   :  { %v1791_v40 = vsel %vm83_vm0, %v1787_v37, 0.0 }
 0xe9e   :  { %1792 = vadd.xlane.f32.xlu2 %v1791_v40 }
 0xf09   :  { %v1790_v20 = vpop.xlane.xlu1 %1789 }
 0xf0a   :  { %v1794_v47 = vmul.f32 %v1790_v20, %v2201_v10 }
 0xf0c   :  { %v1796_v0 = vadd.f32 1e-12, %v1794_v47 }
 0xf0e   :  { %2007 = vrsqrt.f32 %v1796_v0  ;;  %vm1804_vm9 = vweird.f32 %v1796_v0 }
 0xf11   :  { %v1793_v55 = vpop.xlane.xlu2 %1792 }
 0xf12   :  { %v1795_v48 = vmul.f32 %v1793_v55, %v2201_v10  ;;  %v1823_v10 = vperm.slane %v2014_v53, 0 }
 0xf14   :  { %v2008_v49 = vpop.eup %2007  ;;  %v1797_v52 = vadd.f32 1e-12, %v1795_v48 }
 0xf15   :  { %v1799_v41 = vmul.f32 %v2008_v49, %v1796_v0  ;;  %vm1805_vm12 = vweird.f32 %v2008_v49 }
 0xf16   :  { %2009 = vrsqrt.f32 %v1797_v52  ;;  %vm1806_vm3 = vmor %vm1804_vm9, %vm1805_vm12  ;;  %vm1814_vm2 = vweird.f32 %v1797_v52 }
 0xf17   :  { %v1800_v29 = vmul.f32 %v2008_v49, %v1799_v41 }
 0xf19   :  { %v1801_v3 = vmul.f32 0.5, %v1800_v29 }
 0xf1b   :  { %v1802_v56 = vsub.f32 1.5, %v1801_v3 }
 0xf1c   :  { %v2010_v58 = vpop.eup %2009 }
 0xf1d   :  { %v1803_v59 = vmul.f32 %v2008_v49, %v1802_v56  ;;  %v1809_v39 = vmul.f32 %v2010_v58, %v1797_v52  ;;  %vm1815_vm1 = vweird.f32 %v2010_v58 }
 0xf1e   :  { %vm1816_vm4 = vmor %vm1814_vm2, %vm1815_vm1 }
 0xf1f   :  { %v1807_v4 = vsel %vm1806_vm3, %v2008_v49, %v1803_v59  ;;  %v1810_v2 = vmul.f32 %v2010_v58, %v1809_v39 }
 0xf20   :  { %v1818_v6 = vmul.f32 %v1807_v4, %v1784_v63 }
 0xf21   :  { %v1811_v45 = vmul.f32 0.5, %v1810_v2 }
 0xf22   :  { %v1821_v50 = vmul.f32 %v1820_v33, %v1818_v6 }
 0xf23   :  { %v1812_v36 = vsub.f32 1.5, %v1811_v45 }
 0xf24   :  { %v1824_v5 = vadd.f32 %v1823_v10, %v1821_v50 }
 0xf25   :  { %v1813_v14 = vmul.f32 %v2010_v58, %v1812_v36 }
 0xf26   :  { %1826 = vst.msk [vmem:[#allocation8] sm:$0xff] %vm83_vm0, %v1824_v5 }
 0xf27   :  { %v1817_v7 = vsel %vm1816_vm4, %v2010_v58, %v1813_v14 }
 0xf28   :  { %v1819_v27 = vmul.f32 %v1817_v7, %v1785_v34 }
 0xf2a   :  { %v1822_v28 = vmul.f32 %v1820_v33, %v1819_v27 }
 0xf2c   :  { %v1825_v46 = vadd.f32 %v1823_v10, %v1822_v28 }
 0xf2e   :  { %1827 = vst.msk [vmem:[#allocation8 + $0x8] sm:$0xff] %vm83_vm0, %v1825_v46 }
 0xf2f   :  { %1840 = dma.vmem_to_hbm [thread:$0]  %s1833_s12, 256, %s1835_s14, [#allocation4], %s2118_s29, %s2118_s29, %s2119_s30  }
 0xf30   :  { %2115 = dma.done.wait [#allocation4], 256  }
 0xf31   :  { %2116 = vsyncadd [#allocation4], 4294967040 }
 0xf32   :  { %1845 = vsyncpa [#allocation3], 1 }
 0xf33   :  { %1846 = vsyncpa [#allocation6], 1 }
 0xf34   :  { %1847 = vsyncpa [#allocation4], 1 }

</bundles_post_ra>
